<compile_context>
chip_gen: v7x
topology: tpu7x:2x2x1
jax: 0.10.0
libtpu: 0.0.40
codegen_flags: <defaults>
</compile_context>

<pallas_src>
import functools

import jax
import jax.numpy as jnp
from jax.experimental import pallas as pl
from jax.experimental.pallas import tpu as pltpu


def conv3x3_tanh_kernel(x_ref, w_ref, o_ref, xpad_ref, patch_ref, *, H, W, PAD):
    """tanh(conv3x3_same(x, w)) for a block of `bb` images.

    x_ref    : (bb, Cin,  H*W)        NCHW input, spatial flattened on lanes
    w_ref    : (Cout, 9*Cin)          weights, K axis ordered (dy, dx, cin)
    o_ref    : (Cout, bb*H*W)         lane-dense output slab
    xpad_ref : (bb, Cin, 2*PAD+H*W)   VMEM scratch: flat spatial axis with halo
    patch_ref: (9*Cin, bb*H*W)        VMEM scratch: im2col patch (whole block)
    """
    bb, Cin, HW = x_ref.shape

    # --- stage the input into the center of the zero-haloed flat scratch -----
    zeros_halo = jnp.zeros((bb, Cin, PAD), dtype=xpad_ref.dtype)
    xpad_ref[:, :, :PAD] = zeros_halo
    xpad_ref[:, :, PAD + HW:] = zeros_halo
    xpad_ref[:, :, PAD:PAD + HW] = x_ref[...].astype(xpad_ref.dtype)

    # --- column (dx) boundary masks on the flat spatial axis -----------------
    # Row (dy) boundaries are handled for free by the zero halo (PAD >= W+1),
    # so no row masks are needed.
    xcol = jax.lax.broadcasted_iota(jnp.int32, (1, HW), 1) % W
    col_ok = (xcol > 0, None, xcol < W - 1)   # dx = 0, 1, 2 (None = no mask)

    # --- im2col: 9 statically shifted reads per image fill one shared patch --
    for b in range(bb):
        lane0 = b * HW                                   # multiple of 128
        for dy in range(3):
            for dx in range(3):
                off = (dy - 1) * W + (dx - 1)
                sl = xpad_ref[b, :, PAD + off:PAD + off + HW]    # (Cin, HW)
                if col_ok[dx] is not None:
                    sl = jnp.where(col_ok[dx], sl, 0.0)
                t = dy * 3 + dx
                patch_ref[t * Cin:(t + 1) * Cin, lane0:lane0 + HW] = sl

    # --- one fused K = 9*Cin MXU matmul for the whole block, then tanh -------
    acc = jnp.dot(w_ref[...], patch_ref[...],
                  preferred_element_type=jnp.float32)    # (Cout, bb*HW)
    o_ref[...] = jnp.tanh(acc).astype(o_ref.dtype)


def get_generate_image(h_code_nchw, weight_oihw, *, batch_block=None):
    """Equivalent of GetGenerateImage.forward: tanh(Conv3x3(h_code)), no bias.

    h_code_nchw : (N, Cin, H, W)      float32
    weight_oihw : (Cout, Cin, 3, 3)   float32 (PyTorch Conv2d OIHW layout)
    returns     : (N, Cout, H, W)     float32
    """
    N, Cin, H, W = h_code_nchw.shape
    Cout = weight_oihw.shape[0]
    HW = H * W

    # batch_block = N    -> one grid step (best on single-TC v5e / v6e)
    # batch_block = N//2 -> two parallel steps for v7x's two TensorCores
    bb = N if batch_block is None else batch_block
    assert N % bb == 0

    # Halo on the flat spatial axis; 128 keeps the interior store lane-aligned.
    PAD = 128
    assert PAD >= W + 1

    # Free reshape: stay in NCHW, flatten spatial onto the lane axis.
    x_flat = h_code_nchw.reshape(N, Cin, HW)
    # OIHW -> (Cout, dy, dx, Cin) -> (Cout, 9*Cin): one contiguous weight tile.
    w_flat = jnp.transpose(weight_oihw, (0, 2, 3, 1)).reshape(Cout, 9 * Cin)

    kernel = functools.partial(conv3x3_tanh_kernel, H=H, W=W, PAD=PAD)

    # TODO(synk): at real generator resolutions (H,W >= 128) tile over H with a
    # 1-row halo and raise vmem_limit_bytes so blocks fit v7x's 64 MiB VMEM.
    out_slab = pl.pallas_call(
        kernel,
        out_shape=jax.ShapeDtypeStruct((Cout, N * HW), h_code_nchw.dtype),
        grid_spec=pltpu.PrefetchScalarGridSpec(
            num_scalar_prefetch=0,
            grid=(N // bb,),
            in_specs=[
                pl.BlockSpec((bb, Cin, HW), lambda i: (i, 0, 0)),
                pl.BlockSpec((Cout, 9 * Cin), lambda i: (0, 0)),
            ],
            out_specs=pl.BlockSpec((Cout, bb * HW), lambda i: (0, i)),
            scratch_shapes=[
                pltpu.VMEM((bb, Cin, 2 * PAD + HW), jnp.float32),
                pltpu.VMEM((9 * Cin, bb * HW), jnp.float32),
            ],
        ),
        compiler_params=pltpu.CompilerParams(
            dimension_semantics=("parallel",)),
    )(x_flat, w_flat)

    # (Cout, N*HW) lane-dense slab -> NCHW; tiny wrapper-side layout plumbing.
    return jnp.transpose(out_slab.reshape(Cout, N, H, W), (1, 0, 2, 3))


if __name__ == "__main__":
    # GetGenerateImage head of GenerativeNetwork: batch=2, ngf=32, spatial=16.
    # TODO(synk): the remaining GenerativeNetwork submodules (CA_Net
    # reparameterization, InitStage/NextStage upsample+BatchNorm+GLU stacks,
    # ResidualBlocks, word attention) are not lowered to Pallas here; this
    # kernel implements the img_net1 / img_net2 heads (Conv3x3 + Tanh).
    N, ngf, H, W = 2, 32, 16, 16
    key = jax.random.PRNGKey(0)
    k_x, k_w = jax.random.split(key)

    h_code = jax.random.normal(k_x, (N, ngf, H, W), dtype=jnp.float32)
    # Deterministic Conv2d weight, PyTorch OIHW layout: (3, ngf, 3, 3).
    weight = (jax.random.normal(k_w, (3, ngf, 3, 3), dtype=jnp.float32)
              * (1.0 / jnp.sqrt(ngf * 9.0)))

    # Pure-JAX reference: conv3x3 SAME (no bias) + tanh.
    ref = jax.lax.conv_general_dilated(
        h_code, weight, window_strides=(1, 1), padding="SAME",
        dimension_numbers=("NCHW", "OIHW", "NCHW"))
    ref = jnp.tanh(ref)

    # Default path: whole batch in one grid step.
    out = get_generate_image(h_code, weight)
    out = jax.block_until_ready(out)
    assert out.shape == (N, 3, H, W)
    assert jnp.allclose(out, ref, atol=1e-5, rtol=1e-5)

    # Batch-blocked path (per-image grid steps, v7x megacore sharding).
    out_blk = get_generate_image(h_code, weight, batch_block=1)
    out_blk = jax.block_until_ready(out_blk)
    assert jnp.allclose(out_blk, ref, atol=1e-5, rtol=1e-5)

    print("KERNEL_OK")
</pallas_src>

<mosaic_0001>
module attributes {stable_mosaic.version = 11 : i64} {
  func.func @conv3x3_tanh_kernel(%arg0: i32, %arg1: memref<2x32x256xf32, #tpu.memory_space<vmem>>, %arg2: memref<3x288xf32, #tpu.memory_space<vmem>>, %arg3: memref<3x512xf32, #tpu.memory_space<vmem>>, %arg4: memref<2x32x512xf32, #tpu.memory_space<vmem>>, %arg5: memref<288x512xf32, #tpu.memory_space<vmem>>) attributes {dimension_semantics = [#tpu.dimension_semantics<parallel>], iteration_bounds = array<i64: 1>, scalar_prefetch = 0 : i64, scratch_operands = 2 : i64, tpu.core_type = #tpu.core_type<tc>, window_params = [{transform_indices = @transform_0, window_bounds = array<i64: 2, 32, 256>}, {pipeline_mode = #tpu.pipeline_mode<synchronous>, transform_indices = @transform_1, window_bounds = array<i64: 3, 288>}, {transform_indices = @transform_2, window_bounds = array<i64: 3, 512>}]} {
    %cst = arith.constant 0.000000e+00 : f32
    %0 = vector.broadcast %cst : f32 to vector<2x32x128xf32>
    %c0 = arith.constant 0 : index
    %c0_0 = arith.constant 0 : index
    %c0_1 = arith.constant 0 : index
    %1 = vector.load %arg4[%c0, %c0_0, %c0_1] : memref<2x32x512xf32, #tpu.memory_space<vmem>>, vector<2x32x128xf32>
    tpu.vector_store %arg4[%c0, %c0_0, %c0_1], %0 {strides = array<i32>} : memref<2x32x512xf32, #tpu.memory_space<vmem>>, vector<2x32x128xf32>,
    %c0_2 = arith.constant 0 : index
    %c0_3 = arith.constant 0 : index
    %c384 = arith.constant 384 : index
    %2 = vector.load %arg4[%c0_2, %c0_3, %c384] : memref<2x32x512xf32, #tpu.memory_space<vmem>>, vector<2x32x128xf32>
    tpu.vector_store %arg4[%c0_2, %c0_3, %c384], %0 {strides = array<i32>} : memref<2x32x512xf32, #tpu.memory_space<vmem>>, vector<2x32x128xf32>,
    %c0_4 = arith.constant 0 : index
    %c0_5 = arith.constant 0 : index
    %c0_6 = arith.constant 0 : index
    %3 = vector.load %arg1[%c0_4, %c0_5, %c0_6] : memref<2x32x256xf32, #tpu.memory_space<vmem>>, vector<2x32x256xf32>
    %c0_7 = arith.constant 0 : index
    %c0_8 = arith.constant 0 : index
    %c128 = arith.constant 128 : index
    %4 = vector.load %arg4[%c0_7, %c0_8, %c128] : memref<2x32x512xf32, #tpu.memory_space<vmem>>, vector<2x32x256xf32>
    tpu.vector_store %arg4[%c0_7, %c0_8, %c128], %3 {strides = array<i32>} : memref<2x32x512xf32, #tpu.memory_space<vmem>>, vector<2x32x256xf32>,
    %5 = tpu.iota {dimensions = array<i32: 1>} : vector<1x256xi32>
    %c16_i32 = arith.constant 16 : i32
    %c0_i32 = arith.constant 0 : i32
    %6 = arith.cmpi eq, %c16_i32, %c0_i32 : i32
    %c1_i32 = arith.constant 1 : i32
    %7 = arith.select %6, %c1_i32, %c16_i32 : i32
    %8 = vector.broadcast %7 : i32 to vector<1x256xi32>
    %9 = arith.remsi %5, %8 : vector<1x256xi32>
    %c0_i32_9 = arith.constant 0 : i32
    %10 = vector.broadcast %c0_i32_9 : i32 to vector<1x256xi32>
    %11 = arith.cmpi ne, %9, %10 : vector<1x256xi32>
    %c0_i32_10 = arith.constant 0 : i32
    %12 = vector.broadcast %c0_i32_10 : i32 to vector<1x256xi32>
    %13 = arith.cmpi slt, %9, %12 : vector<1x256xi32>
    %c0_i32_11 = arith.constant 0 : i32
    %14 = arith.cmpi slt, %7, %c0_i32_11 : i32
    %15 = vector.broadcast %14 : i1 to vector<1x256xi1>
    %16 = vector.broadcast %15 : vector<1x256xi1> to vector<1x256xi1>
    %17 = arith.xori %13, %16 : vector<1x256xi1>
    %18 = arith.andi %17, %11 : vector<1x256xi1>
    %19 = vector.broadcast %7 : i32 to vector<1x256xi32>
    %20 = arith.addi %9, %19 : vector<1x256xi32>
    %21 = arith.select %18, %20, %9 : vector<1x256xi1>, vector<1x256xi32>
    %c0_i32_12 = arith.constant 0 : i32
    %22 = vector.broadcast %c0_i32_12 : i32 to vector<1x256xi32>
    %23 = arith.cmpi sgt, %21, %22 : vector<1x256xi32>
    %c15_i32 = arith.constant 15 : i32
    %24 = vector.broadcast %c15_i32 : i32 to vector<1x256xi32>
    %25 = arith.cmpi slt, %21, %24 : vector<1x256xi32>
    %c0_13 = arith.constant 0 : index
    %c0_14 = arith.constant 0 : index
    %c111 = arith.constant 111 : index
    %26 = vector.load %arg4[%c0_13, %c0_14, %c111] : memref<2x32x512xf32, #tpu.memory_space<vmem>>, vector<1x32x256xf32>
    %27 = vector.shape_cast %26 : vector<1x32x256xf32> to vector<32x256xf32>
    %cst_15 = arith.constant 0.000000e+00 : f32
    %28 = vector.shape_cast %23 : vector<1x256xi1> to vector<1x256xi1>
    %29 = vector.broadcast %28 : vector<1x256xi1> to vector<32x256xi1>
    %30 = vector.broadcast %cst_15 : f32 to vector<32x256xf32>
    %31 = arith.select %29, %27, %30 : vector<32x256xi1>, vector<32x256xf32>
    %c0_16 = arith.constant 0 : index
    %c0_17 = arith.constant 0 : index
    %32 = vector.load %arg5[%c0_16, %c0_17] : memref<288x512xf32, #tpu.memory_space<vmem>>, vector<32x256xf32>
    tpu.vector_store %arg5[%c0_16, %c0_17], %31 {strides = array<i32>} : memref<288x512xf32, #tpu.memory_space<vmem>>, vector<32x256xf32>,
    %c0_18 = arith.constant 0 : index
    %c0_19 = arith.constant 0 : index
    %c112 = arith.constant 112 : index
    %33 = vector.load %arg4[%c0_18, %c0_19, %c112] : memref<2x32x512xf32, #tpu.memory_space<vmem>>, vector<1x32x256xf32>
    %34 = vector.shape_cast %33 : vector<1x32x256xf32> to vector<32x256xf32>
    %c32 = arith.constant 32 : index
    %c0_20 = arith.constant 0 : index
    %35 = vector.load %arg5[%c32, %c0_20] : memref<288x512xf32, #tpu.memory_space<vmem>>, vector<32x256xf32>
    tpu.vector_store %arg5[%c32, %c0_20], %34 {strides = array<i32>} : memref<288x512xf32, #tpu.memory_space<vmem>>, vector<32x256xf32>,
    %c0_21 = arith.constant 0 : index
    %c0_22 = arith.constant 0 : index
    %c113 = arith.constant 113 : index
    %36 = vector.load %arg4[%c0_21, %c0_22, %c113] : memref<2x32x512xf32, #tpu.memory_space<vmem>>, vector<1x32x256xf32>
    %37 = vector.shape_cast %36 : vector<1x32x256xf32> to vector<32x256xf32>
    %cst_23 = arith.constant 0.000000e+00 : f32
    %38 = vector.shape_cast %25 : vector<1x256xi1> to vector<1x256xi1>
    %39 = vector.broadcast %38 : vector<1x256xi1> to vector<32x256xi1>
    %40 = vector.broadcast %cst_23 : f32 to vector<32x256xf32>
    %41 = arith.select %39, %37, %40 : vector<32x256xi1>, vector<32x256xf32>
    %c64 = arith.constant 64 : index
    %c0_24 = arith.constant 0 : index
    %42 = vector.load %arg5[%c64, %c0_24] : memref<288x512xf32, #tpu.memory_space<vmem>>, vector<32x256xf32>
    tpu.vector_store %arg5[%c64, %c0_24], %41 {strides = array<i32>} : memref<288x512xf32, #tpu.memory_space<vmem>>, vector<32x256xf32>,
    %c0_25 = arith.constant 0 : index
    %c0_26 = arith.constant 0 : index
    %c127 = arith.constant 127 : index
    %43 = vector.load %arg4[%c0_25, %c0_26, %c127] : memref<2x32x512xf32, #tpu.memory_space<vmem>>, vector<1x32x256xf32>
    %44 = vector.shape_cast %43 : vector<1x32x256xf32> to vector<32x256xf32>
    %cst_27 = arith.constant 0.000000e+00 : f32
    %45 = vector.shape_cast %23 : vector<1x256xi1> to vector<1x256xi1>
    %46 = vector.broadcast %45 : vector<1x256xi1> to vector<32x256xi1>
    %47 = vector.broadcast %cst_27 : f32 to vector<32x256xf32>
    %48 = arith.select %46, %44, %47 : vector<32x256xi1>, vector<32x256xf32>
    %c96 = arith.constant 96 : index
    %c0_28 = arith.constant 0 : index
    %49 = vector.load %arg5[%c96, %c0_28] : memref<288x512xf32, #tpu.memory_space<vmem>>, vector<32x256xf32>
    tpu.vector_store %arg5[%c96, %c0_28], %48 {strides = array<i32>} : memref<288x512xf32, #tpu.memory_space<vmem>>, vector<32x256xf32>,
    %c0_29 = arith.constant 0 : index
    %c0_30 = arith.constant 0 : index
    %c128_31 = arith.constant 128 : index
    %50 = vector.load %arg4[%c0_29, %c0_30, %c128_31] : memref<2x32x512xf32, #tpu.memory_space<vmem>>, vector<1x32x256xf32>
    %51 = vector.shape_cast %50 : vector<1x32x256xf32> to vector<32x256xf32>
    %c128_32 = arith.constant 128 : index
    %c0_33 = arith.constant 0 : index
    %52 = vector.load %arg5[%c128_32, %c0_33] : memref<288x512xf32, #tpu.memory_space<vmem>>, vector<32x256xf32>
    tpu.vector_store %arg5[%c128_32, %c0_33], %51 {strides = array<i32>} : memref<288x512xf32, #tpu.memory_space<vmem>>, vector<32x256xf32>,
    %c0_34 = arith.constant 0 : index
    %c0_35 = arith.constant 0 : index
    %c129 = arith.constant 129 : index
    %53 = vector.load %arg4[%c0_34, %c0_35, %c129] : memref<2x32x512xf32, #tpu.memory_space<vmem>>, vector<1x32x256xf32>
    %54 = vector.shape_cast %53 : vector<1x32x256xf32> to vector<32x256xf32>
    %cst_36 = arith.constant 0.000000e+00 : f32
    %55 = vector.shape_cast %25 : vector<1x256xi1> to vector<1x256xi1>
    %56 = vector.broadcast %55 : vector<1x256xi1> to vector<32x256xi1>
    %57 = vector.broadcast %cst_36 : f32 to vector<32x256xf32>
    %58 = arith.select %56, %54, %57 : vector<32x256xi1>, vector<32x256xf32>
    %c160 = arith.constant 160 : index
    %c0_37 = arith.constant 0 : index
    %59 = vector.load %arg5[%c160, %c0_37] : memref<288x512xf32, #tpu.memory_space<vmem>>, vector<32x256xf32>
    tpu.vector_store %arg5[%c160, %c0_37], %58 {strides = array<i32>} : memref<288x512xf32, #tpu.memory_space<vmem>>, vector<32x256xf32>,
    %c0_38 = arith.constant 0 : index
    %c0_39 = arith.constant 0 : index
    %c143 = arith.constant 143 : index
    %60 = vector.load %arg4[%c0_38, %c0_39, %c143] : memref<2x32x512xf32, #tpu.memory_space<vmem>>, vector<1x32x256xf32>
    %61 = vector.shape_cast %60 : vector<1x32x256xf32> to vector<32x256xf32>
    %cst_40 = arith.constant 0.000000e+00 : f32
    %62 = vector.shape_cast %23 : vector<1x256xi1> to vector<1x256xi1>
    %63 = vector.broadcast %62 : vector<1x256xi1> to vector<32x256xi1>
    %64 = vector.broadcast %cst_40 : f32 to vector<32x256xf32>
    %65 = arith.select %63, %61, %64 : vector<32x256xi1>, vector<32x256xf32>
    %c192 = arith.constant 192 : index
    %c0_41 = arith.constant 0 : index
    %66 = vector.load %arg5[%c192, %c0_41] : memref<288x512xf32, #tpu.memory_space<vmem>>, vector<32x256xf32>
    tpu.vector_store %arg5[%c192, %c0_41], %65 {strides = array<i32>} : memref<288x512xf32, #tpu.memory_space<vmem>>, vector<32x256xf32>,
    %c0_42 = arith.constant 0 : index
    %c0_43 = arith.constant 0 : index
    %c144 = arith.constant 144 : index
    %67 = vector.load %arg4[%c0_42, %c0_43, %c144] : memref<2x32x512xf32, #tpu.memory_space<vmem>>, vector<1x32x256xf32>
    %68 = vector.shape_cast %67 : vector<1x32x256xf32> to vector<32x256xf32>
    %c224 = arith.constant 224 : index
    %c0_44 = arith.constant 0 : index
    %69 = vector.load %arg5[%c224, %c0_44] : memref<288x512xf32, #tpu.memory_space<vmem>>, vector<32x256xf32>
    tpu.vector_store %arg5[%c224, %c0_44], %68 {strides = array<i32>} : memref<288x512xf32, #tpu.memory_space<vmem>>, vector<32x256xf32>,
    %c0_45 = arith.constant 0 : index
    %c0_46 = arith.constant 0 : index
    %c145 = arith.constant 145 : index
    %70 = vector.load %arg4[%c0_45, %c0_46, %c145] : memref<2x32x512xf32, #tpu.memory_space<vmem>>, vector<1x32x256xf32>
    %71 = vector.shape_cast %70 : vector<1x32x256xf32> to vector<32x256xf32>
    %cst_47 = arith.constant 0.000000e+00 : f32
    %72 = vector.shape_cast %25 : vector<1x256xi1> to vector<1x256xi1>
    %73 = vector.broadcast %72 : vector<1x256xi1> to vector<32x256xi1>
    %74 = vector.broadcast %cst_47 : f32 to vector<32x256xf32>
    %75 = arith.select %73, %71, %74 : vector<32x256xi1>, vector<32x256xf32>
    %c256 = arith.constant 256 : index
    %c0_48 = arith.constant 0 : index
    %76 = vector.load %arg5[%c256, %c0_48] : memref<288x512xf32, #tpu.memory_space<vmem>>, vector<32x256xf32>
    tpu.vector_store %arg5[%c256, %c0_48], %75 {strides = array<i32>} : memref<288x512xf32, #tpu.memory_space<vmem>>, vector<32x256xf32>,
    %c1 = arith.constant 1 : index
    %c0_49 = arith.constant 0 : index
    %c111_50 = arith.constant 111 : index
    %77 = vector.load %arg4[%c1, %c0_49, %c111_50] : memref<2x32x512xf32, #tpu.memory_space<vmem>>, vector<1x32x256xf32>
    %78 = vector.shape_cast %77 : vector<1x32x256xf32> to vector<32x256xf32>
    %cst_51 = arith.constant 0.000000e+00 : f32
    %79 = vector.shape_cast %23 : vector<1x256xi1> to vector<1x256xi1>
    %80 = vector.broadcast %79 : vector<1x256xi1> to vector<32x256xi1>
    %81 = vector.broadcast %cst_51 : f32 to vector<32x256xf32>
    %82 = arith.select %80, %78, %81 : vector<32x256xi1>, vector<32x256xf32>
    %c0_52 = arith.constant 0 : index
    %c256_53 = arith.constant 256 : index
    %83 = vector.load %arg5[%c0_52, %c256_53] : memref<288x512xf32, #tpu.memory_space<vmem>>, vector<32x256xf32>
    tpu.vector_store %arg5[%c0_52, %c256_53], %82 {strides = array<i32>} : memref<288x512xf32, #tpu.memory_space<vmem>>, vector<32x256xf32>,
    %c1_54 = arith.constant 1 : index
    %c0_55 = arith.constant 0 : index
    %c112_56 = arith.constant 112 : index
    %84 = vector.load %arg4[%c1_54, %c0_55, %c112_56] : memref<2x32x512xf32, #tpu.memory_space<vmem>>, vector<1x32x256xf32>
    %85 = vector.shape_cast %84 : vector<1x32x256xf32> to vector<32x256xf32>
    %c32_57 = arith.constant 32 : index
    %c256_58 = arith.constant 256 : index
    %86 = vector.load %arg5[%c32_57, %c256_58] : memref<288x512xf32, #tpu.memory_space<vmem>>, vector<32x256xf32>
    tpu.vector_store %arg5[%c32_57, %c256_58], %85 {strides = array<i32>} : memref<288x512xf32, #tpu.memory_space<vmem>>, vector<32x256xf32>,
    %c1_59 = arith.constant 1 : index
    %c0_60 = arith.constant 0 : index
    %c113_61 = arith.constant 113 : index
    %87 = vector.load %arg4[%c1_59, %c0_60, %c113_61] : memref<2x32x512xf32, #tpu.memory_space<vmem>>, vector<1x32x256xf32>
    %88 = vector.shape_cast %87 : vector<1x32x256xf32> to vector<32x256xf32>
    %cst_62 = arith.constant 0.000000e+00 : f32
    %89 = vector.shape_cast %25 : vector<1x256xi1> to vector<1x256xi1>
    %90 = vector.broadcast %89 : vector<1x256xi1> to vector<32x256xi1>
    %91 = vector.broadcast %cst_62 : f32 to vector<32x256xf32>
    %92 = arith.select %90, %88, %91 : vector<32x256xi1>, vector<32x256xf32>
    %c64_63 = arith.constant 64 : index
    %c256_64 = arith.constant 256 : index
    %93 = vector.load %arg5[%c64_63, %c256_64] : memref<288x512xf32, #tpu.memory_space<vmem>>, vector<32x256xf32>
    tpu.vector_store %arg5[%c64_63, %c256_64], %92 {strides = array<i32>} : memref<288x512xf32, #tpu.memory_space<vmem>>, vector<32x256xf32>,
    %c1_65 = arith.constant 1 : index
    %c0_66 = arith.constant 0 : index
    %c127_67 = arith.constant 127 : index
    %94 = vector.load %arg4[%c1_65, %c0_66, %c127_67] : memref<2x32x512xf32, #tpu.memory_space<vmem>>, vector<1x32x256xf32>
    %95 = vector.shape_cast %94 : vector<1x32x256xf32> to vector<32x256xf32>
    %cst_68 = arith.constant 0.000000e+00 : f32
    %96 = vector.shape_cast %23 : vector<1x256xi1> to vector<1x256xi1>
    %97 = vector.broadcast %96 : vector<1x256xi1> to vector<32x256xi1>
    %98 = vector.broadcast %cst_68 : f32 to vector<32x256xf32>
    %99 = arith.select %97, %95, %98 : vector<32x256xi1>, vector<32x256xf32>
    %c96_69 = arith.constant 96 : index
    %c256_70 = arith.constant 256 : index
    %100 = vector.load %arg5[%c96_69, %c256_70] : memref<288x512xf32, #tpu.memory_space<vmem>>, vector<32x256xf32>
    tpu.vector_store %arg5[%c96_69, %c256_70], %99 {strides = array<i32>} : memref<288x512xf32, #tpu.memory_space<vmem>>, vector<32x256xf32>,
    %c1_71 = arith.constant 1 : index
    %c0_72 = arith.constant 0 : index
    %c128_73 = arith.constant 128 : index
    %101 = vector.load %arg4[%c1_71, %c0_72, %c128_73] : memref<2x32x512xf32, #tpu.memory_space<vmem>>, vector<1x32x256xf32>
    %102 = vector.shape_cast %101 : vector<1x32x256xf32> to vector<32x256xf32>
    %c128_74 = arith.constant 128 : index
    %c256_75 = arith.constant 256 : index
    %103 = vector.load %arg5[%c128_74, %c256_75] : memref<288x512xf32, #tpu.memory_space<vmem>>, vector<32x256xf32>
    tpu.vector_store %arg5[%c128_74, %c256_75], %102 {strides = array<i32>} : memref<288x512xf32, #tpu.memory_space<vmem>>, vector<32x256xf32>,
    %c1_76 = arith.constant 1 : index
    %c0_77 = arith.constant 0 : index
    %c129_78 = arith.constant 129 : index
    %104 = vector.load %arg4[%c1_76, %c0_77, %c129_78] : memref<2x32x512xf32, #tpu.memory_space<vmem>>, vector<1x32x256xf32>
    %105 = vector.shape_cast %104 : vector<1x32x256xf32> to vector<32x256xf32>
    %cst_79 = arith.constant 0.000000e+00 : f32
    %106 = vector.shape_cast %25 : vector<1x256xi1> to vector<1x256xi1>
    %107 = vector.broadcast %106 : vector<1x256xi1> to vector<32x256xi1>
    %108 = vector.broadcast %cst_79 : f32 to vector<32x256xf32>
    %109 = arith.select %107, %105, %108 : vector<32x256xi1>, vector<32x256xf32>
    %c160_80 = arith.constant 160 : index
    %c256_81 = arith.constant 256 : index
    %110 = vector.load %arg5[%c160_80, %c256_81] : memref<288x512xf32, #tpu.memory_space<vmem>>, vector<32x256xf32>
    tpu.vector_store %arg5[%c160_80, %c256_81], %109 {strides = array<i32>} : memref<288x512xf32, #tpu.memory_space<vmem>>, vector<32x256xf32>,
    %c1_82 = arith.constant 1 : index
    %c0_83 = arith.constant 0 : index
    %c143_84 = arith.constant 143 : index
    %111 = vector.load %arg4[%c1_82, %c0_83, %c143_84] : memref<2x32x512xf32, #tpu.memory_space<vmem>>, vector<1x32x256xf32>
    %112 = vector.shape_cast %111 : vector<1x32x256xf32> to vector<32x256xf32>
    %cst_85 = arith.constant 0.000000e+00 : f32
    %113 = vector.shape_cast %23 : vector<1x256xi1> to vector<1x256xi1>
    %114 = vector.broadcast %113 : vector<1x256xi1> to vector<32x256xi1>
    %115 = vector.broadcast %cst_85 : f32 to vector<32x256xf32>
    %116 = arith.select %114, %112, %115 : vector<32x256xi1>, vector<32x256xf32>
    %c192_86 = arith.constant 192 : index
    %c256_87 = arith.constant 256 : index
    %117 = vector.load %arg5[%c192_86, %c256_87] : memref<288x512xf32, #tpu.memory_space<vmem>>, vector<32x256xf32>
    tpu.vector_store %arg5[%c192_86, %c256_87], %116 {strides = array<i32>} : memref<288x512xf32, #tpu.memory_space<vmem>>, vector<32x256xf32>,
    %c1_88 = arith.constant 1 : index
    %c0_89 = arith.constant 0 : index
    %c144_90 = arith.constant 144 : index
    %118 = vector.load %arg4[%c1_88, %c0_89, %c144_90] : memref<2x32x512xf32, #tpu.memory_space<vmem>>, vector<1x32x256xf32>
    %119 = vector.shape_cast %118 : vector<1x32x256xf32> to vector<32x256xf32>
    %c224_91 = arith.constant 224 : index
    %c256_92 = arith.constant 256 : index
    %120 = vector.load %arg5[%c224_91, %c256_92] : memref<288x512xf32, #tpu.memory_space<vmem>>, vector<32x256xf32>
    tpu.vector_store %arg5[%c224_91, %c256_92], %119 {strides = array<i32>} : memref<288x512xf32, #tpu.memory_space<vmem>>, vector<32x256xf32>,
    %c1_93 = arith.constant 1 : index
    %c0_94 = arith.constant 0 : index
    %c145_95 = arith.constant 145 : index
    %121 = vector.load %arg4[%c1_93, %c0_94, %c145_95] : memref<2x32x512xf32, #tpu.memory_space<vmem>>, vector<1x32x256xf32>
    %122 = vector.shape_cast %121 : vector<1x32x256xf32> to vector<32x256xf32>
    %cst_96 = arith.constant 0.000000e+00 : f32
    %123 = vector.shape_cast %25 : vector<1x256xi1> to vector<1x256xi1>
    %124 = vector.broadcast %123 : vector<1x256xi1> to vector<32x256xi1>
    %125 = vector.broadcast %cst_96 : f32 to vector<32x256xf32>
    %126 = arith.select %124, %122, %125 : vector<32x256xi1>, vector<32x256xf32>
    %c256_97 = arith.constant 256 : index
    %c256_98 = arith.constant 256 : index
    %127 = vector.load %arg5[%c256_97, %c256_98] : memref<288x512xf32, #tpu.memory_space<vmem>>, vector<32x256xf32>
    tpu.vector_store %arg5[%c256_97, %c256_98], %126 {strides = array<i32>} : memref<288x512xf32, #tpu.memory_space<vmem>>, vector<32x256xf32>,
    %c0_99 = arith.constant 0 : index
    %c0_100 = arith.constant 0 : index
    %128 = vector.load %arg2[%c0_99, %c0_100] : memref<3x288xf32, #tpu.memory_space<vmem>>, vector<3x288xf32>
    %c0_101 = arith.constant 0 : index
    %c0_102 = arith.constant 0 : index
    %129 = vector.load %arg5[%c0_101, %c0_102] : memref<288x512xf32, #tpu.memory_space<vmem>>, vector<288x512xf32>
    %cst_103 = arith.constant dense<0.000000e+00> : vector<3x512xf32>
    %130 = tpu.matmul %128, %129, %cst_103 {dimension_numbers = #tpu.dot_dimension_numbers<[1], [0], [0], [1], [0, 0, 1, 1], [], []>} : vector<3x288xf32>, vector<288x512xf32>, vector<3x512xf32> -> vector<3x512xf32>
    %131 = math.tanh %130 : vector<3x512xf32>
    %c0_104 = arith.constant 0 : index
    %c0_105 = arith.constant 0 : index
    %132 = vector.load %arg3[%c0_104, %c0_105] : memref<3x512xf32, #tpu.memory_space<vmem>>, vector<3x512xf32>
    tpu.vector_store %arg3[%c0_104, %c0_105], %131 {strides = array<i32>} : memref<3x512xf32, #tpu.memory_space<vmem>>, vector<3x512xf32>,
    return
  }
  func.func @transform_0(%arg0: i32) -> (i32, i32, i32) {
    %c0_i32 = arith.constant 0 : i32
    %c0_i32_0 = arith.constant 0 : i32
    %c0_i32_1 = arith.constant 0 : i32
    return %arg0, %c0_i32, %c0_i32_0 : i32, i32, i32
  }
  func.func @transform_1(%arg0: i32) -> (i32, i32) {
    %c0_i32 = arith.constant 0 : i32
    %c0_i32_0 = arith.constant 0 : i32
    %c0_i32_1 = arith.constant 0 : i32
    return %c0_i32, %c0_i32_0 : i32, i32
  }
  func.func @transform_2(%arg0: i32) -> (i32, i32) {
    %c0_i32 = arith.constant 0 : i32
    %c0_i32_0 = arith.constant 0 : i32
    return %c0_i32, %arg0 : i32, i32
  }
}

</mosaic_0001>

<bundles_post_ra>
// kernel: tpu_custom_call.1
= control target key start
LH: loop header
LB: loop body
LE: loop exit
PB: predicated region body
PF: predicated region fallthrough
CT: control target
= control target key end

     0   :  { %7 = vsyncpa [#allocation5], 0  ;;  %s3342_s0 = inlined_call_operand.hbm [shape: f32[2,32,256], index: 0, kind: input, shape index: {}]   ;;  %s3343_s1 = inlined_call_operand.hbm [shape: f32[3,288], index: 1, kind: input, shape index: {}]   ;;  %s3344_s2 = inlined_call_operand.hbm [shape: f32[3,512], index: 2, kind: output, shape index: {}]  }
   0x1   :  { %8 = vsyncpa [#allocation8], 0 }
   0x2   :  { %9 = vsyncpa [#allocation6], 0  ;;  %s2753_s9 = smov [#allocation4]   ;;  %s2681_s13 = scalar_lea.hbm %s3342_s0, 2048 }
   0x3   :  { %s15_s10 = sshll.u32 %s2753_s9, 4  ;;  %p2682_p0 = scmp.ne.s32.totalorder %s3342_s0, %s2681_s13  ;;  %s16_s10 = int_to_ptr.vmem [resolvable:$true] %s15_s10 }
   0x4   :  { %p2685_p1 = scmp.lt.u32.totalorder %s2681_s13, %s3342_s0 }
   0x6   :  { %p2687_p2 = pnand %p2685_p1, %p2682_p0 }
   0x8   :  { %2690 = shalt.err (!%p2687_p2)
}
   0x9   :  { %s2691_s18 = scalar_lea.vmem %s16_s10, 2048  ;;  %p2696_p4 = scmp.lt.s32.totalorder %s16_s10, %s16_s10 }
   0xa   :  { %p2692_p3 = scmp.ne.s32.totalorder %s16_s10, %s2691_s18  ;;  %p2697_p5 = scmp.lt.s32.totalorder %s2691_s18, %s2691_s18 }
   0xc   :  { %p2698_p6 = por %p2697_p5, %p2696_p4 }
   0xe   :  { %p2699_p7 = pnand %p2698_p6, %p2692_p3 }
  0x10   :  { %2702 = shalt.err (!%p2699_p7)
}
  0x11   :  { %s2754_s19 = smov 256   ;;  %s2755_s20 = smov 16  }
  0x12   :  { %21 = dma.hbm_to_vmem [thread:$0]  %s3342_s0, 2048, %s16_s10, [#allocation5], %s2754_s19, %s2754_s19, %s2755_s20  }
  0x13   :  { %s2756_s23 = smov [#allocation7]   ;;  %s2703_s27 = scalar_lea.hbm %s3343_s1, 192 }
  0x14   :  { %s28_s24 = sshll.u32 %s2756_s23, 4  ;;  %p2704_p8 = scmp.ne.s32.totalorder %s3343_s1, %s2703_s27  ;;  %s29_s24 = int_to_ptr.vmem [resolvable:$true] %s28_s24 }
  0x15   :  { %p2707_p9 = scmp.lt.u32.totalorder %s2703_s27, %s3343_s1 }
  0x17   :  { %p2709_p10 = pnand %p2707_p9, %p2704_p8 }
  0x19   :  { %2712 = shalt.err (!%p2709_p10)
}
  0x1a   :  { %s2713_s4 = scalar_lea.vmem %s29_s24, 192  ;;  %p2718_p12 = scmp.lt.s32.totalorder %s29_s24, %s29_s24 }
  0x1b   :  { %p2714_p11 = scmp.ne.s32.totalorder %s29_s24, %s2713_s4  ;;  %p2719_p13 = scmp.lt.s32.totalorder %s2713_s4, %s2713_s4 }
  0x1d   :  { %p2720_p0 = por %p2719_p13, %p2718_p12 }
  0x1f   :  { %p2721_p1 = pnand %p2720_p0, %p2714_p11 }
  0x21   :  { %2724 = shalt.err (!%p2721_p1)
}
  0x22   :  { %31 = dma.hbm_to_vmem [thread:$0]  %s3343_s1, 192, %s29_s24, [#allocation8]  }
  0x23   :  { %2747 = dma.done.wait [#allocation5], 2048  }
  0x24   :  { %2748 = vsyncadd [#allocation5], 4294965248 }
  0x25   :  { %2749 = dma.done.wait [#allocation8], 192  }
  0x26   :  { %2750 = vsyncadd [#allocation8], 4294967104  ;;  %v2806_v0 = vld [vmem:[#allocation4 + $0x10] sm:$0xff]  ;;  %v2808_v1 = vld [vmem:[#allocation4 + $0x18] sm:$0xff]  ;;  %v2757_v4 = vmov 0.0   ;;  %s2758_s1 = smov 17   ;;  %v86_v34 = vlaneseq }
  0x27   :  { %v2810_v2 = vld [vmem:[#allocation4] sm:$0xff]  ;;  %v2814_v3 = vpack.i.bf16 %v2808_v1, %v2806_v0  ;;  %v2820_v7 = vld [vmem:[#allocation4 + $0x8] sm:$0xff]  ;;  %v2831_v10 = vld [vmem:[#allocation4 + $0x30] sm:$0xff]  ;;  %s2759_s6 = smov 15   ;;  %s2760_s7 = smov 1   ;;  %v2914_v29 = vpack.i.bf16 %v2757_v4, %v2808_v1  ;;  %vm169_vm0 = vcmask 138240  }
  0x28   :  { %v2188_v5 = vpack.i.bf16 %v2810_v2, %v2757_v4  ;;  %v2818_v6 = vld [vmem:[#allocation4 + $0x20] sm:$0xff]  ;;  %v2829_v9 = vpack.i.bf16 %v2757_v4, %v2820_v7  ;;  %v2833_v11 = vld [vmem:[#allocation4 + $0x38] sm:$0xff]  ;;  %v2835_v12 = vld [vmem:[#allocation4 + $0x28] sm:$0xff]  ;;  %v2248_v27 = vpack.i.bf16 %v2820_v7, %v2810_v2  ;;  %s2761_s8 = smov 127   ;;  %v2938_v33 = vpack.i.bf16 %v2806_v0, %v2810_v2  ;;  %s2762_s9 = smov 113  }
  0x29   :  { %2199 = vrot.lane.b32.xlu1 %v2814_v3, %s2758_s1  ;;  %v2203_v8 = vpack.i.bf16 %v2818_v6, %v2757_v4  ;;  %v2213_v13 = vpack.i.bf16 %v2833_v11, %v2831_v10  ;;  %v2844_v14 = vpack.i.bf16 %v2757_v4, %v2835_v12  ;;  %v2846_v15 = vld [vmem:[#allocation4 + $0x50] sm:$0xff]  ;;  %v2848_v16 = vld [vmem:[#allocation4 + $0x58] sm:$0xff]  ;;  %v2850_v17 = vld [vmem:[#allocation4 + $0x40] sm:$0xff]  ;;  %v2278_v28 = vpack.i.bf16 %v2835_v12, %v2818_v6  ;;  %s2763_s10 = smov 112   ;;  %s2764_s11 = smov 111  }
  0x2a   :  { %2189 = vrot.lane.b32.xlu0 %v2188_v5, %s2758_s1  ;;  %v2852_v18 = vld [vmem:[#allocation4 + $0x48] sm:$0xff]  ;;  %v2223_v19 = vpack.i.bf16 %v2848_v16, %v2846_v15  ;;  %v2861_v21 = vld [vmem:[#allocation4 + $0x60] sm:$0xff]  ;;  %v2869_v24 = vld [vmem:[#allocation4 + $0x70] sm:$0xff]  ;;  %v2922_v30 = vpack.i.bf16 %v2757_v4, %v2848_v16  ;;  %v2934_v32 = vpack.i.bf16 %v2846_v15, %v2850_v17  ;;  %v2946_v35 = vpack.i.bf16 %v2757_v4, %v2833_v11  ;;  %s2765_s12 = smov [#allocation9]  }
  0x2b   :  { %v2218_v20 = vpack.i.bf16 %v2852_v18, %v2850_v17  ;;  %v2863_v22 = vld [vmem:[#allocation4 + $0x68] sm:$0xff]  ;;  %v2871_v25 = vld [vmem:[#allocation4 + $0x78] sm:$0xff]  ;;  %v2926_v31 = vpack.i.bf16 %v2757_v4, %v2852_v18  ;;  %v2948_v36 = vand.u32 127, %v86_v34  ;;  %v2971_v40 = vpack.i.bf16 %v2869_v24, %v2861_v21  ;;  %s1871_s13 = sshll.u32 %s2765_s12, 4  ;;  %s1872_s13 = int_to_ptr.vmem [resolvable:$true] %s1871_s13 }
  0x2c   :  { %v2233_v23 = vpack.i.bf16 %v2863_v22, %v2861_v21  ;;  %v2238_v26 = vpack.i.bf16 %v2871_v25, %v2869_v24  ;;  %v2956_v37 = vpack.i.bf16 %v2757_v4, %v2871_v25  ;;  %v2960_v38 = vpack.i.bf16 %v2757_v4, %v2863_v22  ;;  %s2725_s14 = scalar_lea.vmem %s1872_s13, 256  ;;  %p2730_p3 = scmp.lt.s32.totalorder %s1872_s13, %s1872_s13 }
  0x2d   :  { %2204 = vrot.lane.b32.xlu1 %v2203_v8, %s2758_s1  ;;  %v2963_v39 = vadd.s32 128, %v2948_v36  ;;  %v2975_v41 = vpack.i.bf16 %v2831_v10, %v2818_v6  ;;  %v93_v45 = vand.u32 15, %v2948_v36  ;;  %vm250_vm5 = vcmask 130048   ;;  %p2726_p2 = scmp.ne.s32.totalorder %s1872_s13, %s2725_s14  ;;  %p2731_p4 = scmp.lt.s32.totalorder %s2725_s14, %s2725_s14 }
  0x2e   :  { %2194 = vrot.lane.b32.xlu0 %v2829_v9, %s2758_s1  ;;  %vm327_vm6 = vcmask 121856   ;;  %vm408_vm11 = vcmask 7168   ;;  %vm505_vm12 = vcmask 1039360   ;;  %vm586_vm13 = vcmask 924672  }
  0x2f   :  { %v100_v44 = vand.u32 15, %v2963_v39  ;;  %vm113_vm2 = vcmp.gt.s32.totalorder %v93_v45, 0  ;;  %vm3113_vm9 = vcmp.lt.s32.totalorder %v93_v45, 15  ;;  %vm667_vm14 = vcmask 916480   ;;  %p2732_p5 = por %p2731_p4, %p2730_p3 }
  0x30   :  { %vm2999_vm4 = vmpackc.low %vm113_vm2, %vm113_vm2  ;;  %vm740_vm15 = vcmask 908288  }
  0x31   :  { %2214 = vrot.lane.b32.xlu1 %v2213_v13, %s2758_s1  ;;  %vm114_vm1 = vcmp.gt.s32.totalorder %v100_v44, 0  ;;  %vm116_vm7 = vcmp.lt.s32.totalorder %v100_v44, 15  ;;  %vm3130_vm10 = vmpackc.low %vm3113_vm9, %vm3113_vm9  ;;  %p2733_p6 = pnand %p2732_p5, %p2726_p2 }
  0x32   :  { %2209 = vrot.lane.b32.xlu0 %v2844_v14, %s2758_s1  ;;  %vm2995_vm3 = vmpackc.low %vm114_vm1, %vm114_vm1 }
  0x33   :  { %vm3097_vm8 = vmpackc.low %vm116_vm7, %vm116_vm7 }
  0x35   :  { %2224 = vrot.lane.b32.xlu1 %v2223_v19, %s2758_s1 }
  0x36   :  { %2219 = vrot.lane.b32.xlu0 %v2218_v20, %s2758_s1 }
  0x39   :  { %2234 = vrot.lane.b32.xlu1 %v2233_v23, %s2758_s1 }
  0x3a   :  { %2229 = vrot.lane.b32.xlu0 %v2757_v4, %s2758_s1 }
  0x3d   :  { %2244 = vrot.lane.b32.xlu1 %v2757_v4, %s2758_s1 }
  0x3e   :  { %2239 = vrot.lane.b32.xlu0 %v2238_v26, %s2758_s1 }
  0x41   :  { %2254 = vrot.lane.b32.xlu1 %v2814_v3, %s2755_s20 }
  0x42   :  { %2249 = vrot.lane.b32.xlu0 %v2248_v27, %s2755_s20 }
  0x45   :  { %2264 = vrot.lane.b32.xlu1 %v2223_v19, %s2755_s20 }
  0x46   :  { %2259 = vrot.lane.b32.xlu0 %v2218_v20, %s2755_s20 }
  0x49   :  { %2274 = vrot.lane.b32.xlu1 %v2757_v4, %s2755_s20 }
  0x4a   :  { %2269 = vrot.lane.b32.xlu0 %v2757_v4, %s2755_s20 }
  0x4d   :  { %2284 = vrot.lane.b32.xlu1 %v2213_v13, %s2755_s20 }
  0x4e   :  { %2279 = vrot.lane.b32.xlu0 %v2278_v28, %s2755_s20 }
  0x51   :  { %2294 = vrot.lane.b32.xlu1 %v2238_v26, %s2755_s20 }
  0x52   :  { %2289 = vrot.lane.b32.xlu0 %v2233_v23, %s2755_s20 }
  0x55   :  { %2304 = vrot.lane.b32.xlu1 %v2757_v4, %s2755_s20 }
  0x56   :  { %2299 = vrot.lane.b32.xlu0 %v2757_v4, %s2755_s20 }
  0x59   :  { %2314 = vrot.lane.b32.xlu1 %v2814_v3, %s2759_s6 }
  0x5a   :  { %2309 = vrot.lane.b32.xlu0 %v2248_v27, %s2759_s6 }
  0x5d   :  { %2324 = vrot.lane.b32.xlu1 %v2223_v19, %s2759_s6 }
  0x5e   :  { %2319 = vrot.lane.b32.xlu0 %v2218_v20, %s2759_s6 }
  0x61   :  { %2334 = vrot.lane.b32.xlu1 %v2757_v4, %s2759_s6 }
  0x62   :  { %2329 = vrot.lane.b32.xlu0 %v2757_v4, %s2759_s6 }
  0x65   :  { %2344 = vrot.lane.b32.xlu1 %v2213_v13, %s2759_s6 }
  0x66   :  { %2339 = vrot.lane.b32.xlu0 %v2278_v28, %s2759_s6 }
  0x69   :  { %2354 = vrot.lane.b32.xlu1 %v2238_v26, %s2759_s6 }
  0x6a   :  { %2349 = vrot.lane.b32.xlu0 %v2233_v23, %s2759_s6 }
  0x6d   :  { %2364 = vrot.lane.b32.xlu1 %v2757_v4, %s2759_s6 }
  0x6e   :  { %2359 = vrot.lane.b32.xlu0 %v2757_v4, %s2759_s6 }
  0x71   :  { %2374 = vrot.lane.b32.xlu1 %v2814_v3, %s2760_s7 }
  0x72   :  { %2369 = vrot.lane.b32.xlu0 %v2248_v27, %s2760_s7 }
  0x75   :  { %2384 = vrot.lane.b32.xlu1 %v2223_v19, %s2760_s7 }
  0x76   :  { %2379 = vrot.lane.b32.xlu0 %v2218_v20, %s2760_s7 }
  0x79   :  { %2394 = vrot.lane.b32.xlu1 %v2757_v4, %s2760_s7 }
  0x7a   :  { %2389 = vrot.lane.b32.xlu0 %v2757_v4, %s2760_s7 }
  0x7d   :  { %2404 = vrot.lane.b32.xlu1 %v2213_v13, %s2760_s7 }
  0x7e   :  { %2399 = vrot.lane.b32.xlu0 %v2278_v28, %s2760_s7 }
  0x81   :  { %2414 = vrot.lane.b32.xlu1 %v2238_v26, %s2760_s7 }
  0x82   :  { %2409 = vrot.lane.b32.xlu0 %v2233_v23, %s2760_s7 }
  0x85   :  { %2424 = vrot.lane.b32.xlu1 %v2757_v4, %s2760_s7 }
  0x86   :  { %2419 = vrot.lane.b32.xlu0 %v2757_v4, %s2760_s7 }
  0x89   :  { %2434 = vrot.lane.b32.xlu1 %v2914_v29, %s2761_s8 }
  0x8a   :  { %2429 = vrot.lane.b32.xlu0 %v2829_v9, %s2761_s8 }
  0x8d   :  { %2444 = vrot.lane.b32.xlu1 %v2922_v30, %s2761_s8 }
  0x8e   :  { %2439 = vrot.lane.b32.xlu0 %v2926_v31, %s2761_s8 }
  0x91   :  { %2454 = vrot.lane.b32.xlu1 %v2934_v32, %s2761_s8 }
  0x92   :  { %2449 = vrot.lane.b32.xlu0 %v2938_v33, %s2761_s8 }
  0x95   :  { %2464 = vrot.lane.b32.xlu1 %v2946_v35, %s2761_s8 }
  0x96   :  { %2459 = vrot.lane.b32.xlu0 %v2844_v14, %s2761_s8 }
  0x99   :  { %2474 = vrot.lane.b32.xlu1 %v2956_v37, %s2761_s8 }
  0x9a   :  { %2469 = vrot.lane.b32.xlu0 %v2960_v38, %s2761_s8 }
  0x9b   :  { %v2200_v42 = vpop.permute.xlu1 %2199 }
  0x9c   :  { %v2190_v43 = vpop.permute.xlu0 %2189  ;;  %v2202_v46 = vunpack.i.h.bf16 %v2200_v42  ;;  %v2201_v47 = vunpack.i.l.bf16 %v2200_v42 }
  0x9d   :  { %v2192_v48 = vunpack.i.h.bf16 %v2190_v43  ;;  %v2191_v49 = vunpack.i.l.bf16 %v2190_v43  ;;  %2484 = vrot.lane.b32.xlu1 %v2971_v40, %s2761_s8 }
  0x9e   :  { %2479 = vrot.lane.b32.xlu0 %v2975_v41, %s2761_s8  ;;  %v173_v54 = vsel %vm169_vm0, %v2201_v47, %v2202_v46 }
  0x9f   :  { %v2205_v50 = vpop.permute.xlu1 %2204  ;;  %v170_v55 = vsel %vm169_vm0, %v2191_v49, %v2192_v48 }
  0xa0   :  { %v2195_v51 = vpop.permute.xlu0 %2194  ;;  %v2207_v56 = vunpack.i.h.bf16 %v2205_v50  ;;  %v2206_v57 = vunpack.i.l.bf16 %v2205_v50 }
  0xa1   :  { %v2197_v52 = vunpack.i.h.bf16 %v2195_v51  ;;  %v2196_v53 = vunpack.i.l.bf16 %v2195_v51  ;;  %2494 = vrot.lane.b32.xlu1 %v2914_v29, %s2762_s9 }
  0xa2   :  { %2489 = vrot.lane.b32.xlu0 %v2829_v9, %s2762_s9  ;;  %v174_v10 = vsel %vm169_vm0, %v2206_v57, %v2207_v56 }
  0xa3   :  { %v171_v58 = vsel %vm169_vm0, %v2192_v48, %v2196_v53  ;;  %v172_v59 = vsel %vm169_vm0, %v2197_v52, %v2201_v47  ;;  %v2215_v60 = vpop.permute.xlu1 %2214 }
  0xa4   :  { %v2210_v61 = vpop.permute.xlu0 %2209  ;;  %v1979_v62 = vpack.c.bf16 %v173_v54, %v171_v58  ;;  %v1982_v0 = vpack.c.bf16 %v172_v59, %v170_v55  ;;  %v2217_v2 = vunpack.i.h.bf16 %v2215_v60  ;;  %v2216_v3 = vunpack.i.l.bf16 %v2215_v60 }
  0xa5   :  { %v2212_v5 = vunpack.i.h.bf16 %v2210_v61  ;;  %v2211_v6 = vunpack.i.l.bf16 %v2210_v61  ;;  %2504 = vrot.lane.b32.xlu1 %v2922_v30, %s2762_s9 }
  0xa6   :  { %2499 = vrot.lane.b32.xlu0 %v2926_v31, %s2762_s9  ;;  %v177_v13 = vsel %vm169_vm0, %v2216_v3, %v2217_v2  ;;  %1981 = vmatprep.subr.msk.bf16.mxu0 %vm2995_vm3, %v1979_v62 }
  0xa7   :  { %v176_v19 = vsel %vm169_vm0, %v2212_v5, %v2216_v3  ;;  %v175_v20 = vsel %vm169_vm0, %v2207_v56, %v2211_v6  ;;  %1984 = vmatpush1.bf16.msk.msra.mxu0 %vm2999_vm4, %v1982_v0  ;;  %v2225_v27 = vpop.permute.xlu1 %2224 }
  0xa8   :  { %v1988_v23 = vpack.c.bf16 %v176_v19, %v174_v10  ;;  %v1985_v26 = vpack.c.bf16 %v177_v13, %v175_v20  ;;  %v2220_v28 = vpop.permute.xlu0 %2219  ;;  %v2227_v34 = vunpack.i.h.bf16 %v2225_v27  ;;  %v2226_v42 = vunpack.i.l.bf16 %v2225_v27 }
  0xa9   :  { %v2222_v43 = vunpack.i.h.bf16 %v2220_v28  ;;  %v2221_v46 = vunpack.i.l.bf16 %v2220_v28  ;;  %2514 = vrot.lane.b32.xlu1 %v2934_v32, %s2762_s9 }
  0xaa   :  { %2509 = vrot.lane.b32.xlu0 %v2938_v33, %s2762_s9  ;;  %1987 = vmatprep.subr.msk.bf16.mxu0 %vm2995_vm3, %v1985_v26  ;;  %v825_v48 = vsel %vm169_vm0, %v2226_v42, %v2227_v34 }
  0xab   :  { %v823_v47 = vsel %vm169_vm0, %v2221_v46, %v2222_v43  ;;  %1990 = vmatpush1.bf16.msk.msra.mxu0 %vm2999_vm4, %v1988_v23  ;;  %v2235_v49 = vpop.permute.xlu1 %2234 }
  0xac   :  { %v2230_v50 = vpop.permute.xlu0 %2229  ;;  %v2075_v51 = vpack.c.bf16 %v825_v48, %v823_v47  ;;  %v2237_v54 = vunpack.i.h.bf16 %v2235_v49  ;;  %v2236_v55 = vunpack.i.l.bf16 %v2235_v49 }
  0xad   :  { %v2232_v52 = vunpack.i.h.bf16 %v2230_v50  ;;  %v2231_v53 = vunpack.i.l.bf16 %v2230_v50  ;;  %2524 = vrot.lane.b32.xlu1 %v2946_v35, %s2762_s9 }
  0xae   :  { %2519 = vrot.lane.b32.xlu0 %v2844_v14, %s2762_s9  ;;  %2077 = vmatprep.subr.msk.bf16.mxu1 %vm2995_vm3, %v2075_v51  ;;  %v827_v3 = vsel %vm169_vm0, %v2236_v55, %v2237_v54 }
  0xaf   :  { %v822_v56 = vsel %vm169_vm0, %v2231_v53, %v2221_v46  ;;  %v824_v57 = vsel %vm169_vm0, %v2232_v52, %v2226_v42  ;;  %v2245_v58 = vpop.permute.xlu1 %2244 }
  0xb0   :  { %v2240_v59 = vpop.permute.xlu0 %2239  ;;  %v2078_v60 = vpack.c.bf16 %v824_v57, %v822_v56  ;;  %v2247_v61 = vunpack.i.h.bf16 %v2245_v58  ;;  %v2246_v62 = vunpack.i.l.bf16 %v2245_v58 }
  0xb1   :  { %v2242_v0 = vunpack.i.h.bf16 %v2240_v59  ;;  %v2241_v2 = vunpack.i.l.bf16 %v2240_v59  ;;  %2534 = vrot.lane.b32.xlu1 %v2956_v37, %s2762_s9 }
  0xb2   :  { %2529 = vrot.lane.b32.xlu0 %v2960_v38, %s2762_s9  ;;  %v826_v5 = vsel %vm169_vm0, %v2246_v62, %v2236_v55  ;;  %2080 = vmatpush1.bf16.msk.msra.mxu1 %vm2999_vm4, %v2078_v60 }
  0xb3   :  { %v828_v6 = vsel %vm169_vm0, %v2247_v61, %v2241_v2  ;;  %v829_v10 = vsel %vm169_vm0, %v2241_v2, %v2242_v0  ;;  %v2255_v20 = vpop.permute.xlu1 %2254  ;;  %vm1564_vm0 = vcmask 261120  }
  0xb4   :  { %v2081_v13 = vpack.c.bf16 %v829_v10, %v827_v3  ;;  %v2084_v19 = vpack.c.bf16 %v828_v6, %v826_v5  ;;  %v2250_v23 = vpop.permute.xlu0 %2249  ;;  %v2257_v26 = vunpack.i.h.bf16 %v2255_v20  ;;  %v2256_v27 = vunpack.i.l.bf16 %v2255_v20 }
  0xb5   :  { %v2252_v28 = vunpack.i.h.bf16 %v2250_v23  ;;  %v2251_v34 = vunpack.i.l.bf16 %v2250_v23  ;;  %2544 = vrot.lane.b32.xlu1 %v2971_v40, %s2762_s9 }
  0xb6   :  { %2539 = vrot.lane.b32.xlu0 %v2975_v41, %s2762_s9  ;;  %2083 = vmatprep.subr.msk.bf16.mxu1 %vm2995_vm3, %v2081_v13  ;;  %v254_v43 = vsel %vm250_vm5, %v2256_v27, %v2257_v26 }
  0xb7   :  { %v252_v42 = vsel %vm250_vm5, %v2251_v34, %v2252_v28  ;;  %2086 = vmatpush1.bf16.msk.msra.mxu1 %vm2999_vm4, %v2084_v19  ;;  %v2265_v46 = vpop.permute.xlu1 %2264 }
  0xb8   :  { %v2260_v47 = vpop.permute.xlu0 %2259  ;;  %v1991_v48 = vpack.c.bf16 %v254_v43, %v252_v42  ;;  %v2267_v49 = vunpack.i.h.bf16 %v2265_v46  ;;  %v2266_v50 = vunpack.i.l.bf16 %v2265_v46 }
  0xb9   :  { %v2262_v51 = vunpack.i.h.bf16 %v2260_v47  ;;  %v2261_v52 = vunpack.i.l.bf16 %v2260_v47  ;;  %2554 = vrot.lane.b32.xlu1 %v2914_v29, %s2763_s10 }
  0xba   :  { %2549 = vrot.lane.b32.xlu0 %v2829_v9, %s2763_s10  ;;  %1992 = vmatprep.subr.bf16.mxu0 %v1991_v48  ;;  %v905_v54 = vsel %vm250_vm5, %v2266_v50, %v2267_v49 }
  0xbb   :  { %v903_v53 = vsel %vm250_vm5, %v2261_v52, %v2262_v51  ;;  %v2275_v55 = vpop.permute.xlu1 %2274 }
  0xbc   :  { %v2270_v56 = vpop.permute.xlu0 %2269  ;;  %v2087_v57 = vpack.c.bf16 %v905_v54, %v903_v53  ;;  %v2277_v58 = vunpack.i.h.bf16 %v2275_v55  ;;  %v2276_v59 = vunpack.i.l.bf16 %v2275_v55 }
  0xbd   :  { %v2272_v60 = vunpack.i.h.bf16 %v2270_v56  ;;  %v2271_v61 = vunpack.i.l.bf16 %v2270_v56  ;;  %2564 = vrot.lane.b32.xlu1 %v2922_v30, %s2763_s10 }
  0xbe   :  { %2559 = vrot.lane.b32.xlu0 %v2926_v31, %s2763_s10  ;;  %2088 = vmatprep.subr.bf16.mxu1 %v2087_v57  ;;  %v902_v2 = vsel %vm250_vm5, %v2276_v59, %v2261_v52  ;;  %v904_v3 = vsel %vm250_vm5, %v2277_v58, %v2266_v50 }
  0xbf   :  { %v251_v62 = vsel %vm250_vm5, %v2271_v61, %v2251_v34  ;;  %v253_v0 = vsel %vm250_vm5, %v2272_v60, %v2256_v27  ;;  %v2285_v5 = vpop.permute.xlu1 %2284  ;;  %v2089_v13 = vpack.c.bf16 %v904_v3, %v902_v2 }
  0xc0   :  { %v2280_v6 = vpop.permute.xlu0 %2279  ;;  %v1993_v10 = vpack.c.bf16 %v253_v0, %v251_v62  ;;  %v2287_v19 = vunpack.i.h.bf16 %v2285_v5  ;;  %v2286_v20 = vunpack.i.l.bf16 %v2285_v5 }
  0xc1   :  { %v2282_v23 = vunpack.i.h.bf16 %v2280_v6  ;;  %v2281_v26 = vunpack.i.l.bf16 %v2280_v6  ;;  %2574 = vrot.lane.b32.xlu1 %v2934_v32, %s2763_s10  ;;  %2090 = vmatpush1.bf16.msra.mxu1 %v2089_v13 }
  0xc2   :  { %2569 = vrot.lane.b32.xlu0 %v2938_v33, %s2763_s10  ;;  %1994 = vmatpush1.bf16.msra.mxu0 %v1993_v10  ;;  %v258_v28 = vsel %vm250_vm5, %v2286_v20, %v2287_v19 }
  0xc3   :  { %v256_v27 = vsel %vm250_vm5, %v2281_v26, %v2282_v23  ;;  %v2295_v34 = vpop.permute.xlu1 %2294 }
  0xc4   :  { %v2290_v42 = vpop.permute.xlu0 %2289  ;;  %v1995_v43 = vpack.c.bf16 %v258_v28, %v256_v27  ;;  %v2297_v46 = vunpack.i.h.bf16 %v2295_v34  ;;  %v2296_v47 = vunpack.i.l.bf16 %v2295_v34 }
  0xc5   :  { %v2292_v48 = vunpack.i.h.bf16 %v2290_v42  ;;  %v2291_v49 = vunpack.i.l.bf16 %v2290_v42  ;;  %2584 = vrot.lane.b32.xlu1 %v2946_v35, %s2763_s10 }
  0xc6   :  { %2579 = vrot.lane.b32.xlu0 %v2844_v14, %s2763_s10  ;;  %1996 = vmatprep.subr.bf16.mxu0 %v1995_v43  ;;  %v909_v51 = vsel %vm250_vm5, %v2296_v47, %v2297_v46 }
  0xc7   :  { %v907_v50 = vsel %vm250_vm5, %v2291_v49, %v2292_v48  ;;  %v2305_v52 = vpop.permute.xlu1 %2304 }
  0xc8   :  { %v2300_v53 = vpop.permute.xlu0 %2299  ;;  %v2091_v54 = vpack.c.bf16 %v909_v51, %v907_v50  ;;  %v2307_v55 = vunpack.i.h.bf16 %v2305_v52  ;;  %v2306_v56 = vunpack.i.l.bf16 %v2305_v52 }
  0xc9   :  { %v2302_v57 = vunpack.i.h.bf16 %v2300_v53  ;;  %v2301_v58 = vunpack.i.l.bf16 %v2300_v53  ;;  %2594 = vrot.lane.b32.xlu1 %v2956_v37, %s2763_s10 }
  0xca   :  { %2589 = vrot.lane.b32.xlu0 %v2960_v38, %s2763_s10  ;;  %2092 = vmatprep.subr.bf16.mxu1 %v2091_v54  ;;  %v906_v61 = vsel %vm250_vm5, %v2306_v56, %v2291_v49  ;;  %v908_v62 = vsel %vm250_vm5, %v2307_v55, %v2296_v47 }
  0xcb   :  { %v255_v59 = vsel %vm250_vm5, %v2301_v58, %v2281_v26  ;;  %v257_v60 = vsel %vm250_vm5, %v2302_v57, %v2286_v20  ;;  %v2315_v0 = vpop.permute.xlu1 %2314  ;;  %v2093_v5 = vpack.c.bf16 %v908_v62, %v906_v61  ;;  %v3095_v26 = vld [vmem:[#allocation7] sm:$0x77] }
  0xcc   :  { %v2310_v2 = vpop.permute.xlu0 %2309  ;;  %v1997_v3 = vpack.c.bf16 %v257_v60, %v255_v59  ;;  %v2317_v6 = vunpack.i.h.bf16 %v2315_v0  ;;  %v2316_v10 = vunpack.i.l.bf16 %v2315_v0  ;;  %v1562_v34 = vcombine.high %v3095_v26, %v3095_v26 }
  0xcd   :  { %v2312_v13 = vunpack.i.h.bf16 %v2310_v2  ;;  %v2311_v19 = vunpack.i.l.bf16 %v2310_v2  ;;  %2604 = vrot.lane.b32.xlu1 %v2971_v40, %s2763_s10  ;;  %2094 = vmatpush1.bf16.msra.mxu1 %v2093_v5 }
  0xce   :  { %2599 = vrot.lane.b32.xlu0 %v2975_v41, %s2763_s10  ;;  %v331_v20 = vsel %vm327_vm6, %v2316_v10, %v2317_v6  ;;  %1998 = vmatpush1.bf16.msra.mxu0 %v1997_v3 }
  0xcf   :  { %v329_v23 = vsel %vm327_vm6, %v2311_v19, %v2312_v13  ;;  %v2325_v44 = vpop.permute.xlu1 %2324  ;;  %1631 = vmatprep.mubr.f32.mxu0 %v1562_v34  ;;  %1773 = vmatprep.mubr.f32.mxu1 %v1562_v34 }
  0xd0   :  { %v1999_v39 = vpack.c.bf16 %v331_v20, %v329_v23  ;;  %v2320_v27 = vpop.permute.xlu0 %2319  ;;  %v2327_v42 = vunpack.i.h.bf16 %v2325_v44  ;;  %v2326_v43 = vunpack.i.l.bf16 %v2325_v44 }
  0xd1   :  { %v2322_v46 = vunpack.i.h.bf16 %v2320_v27  ;;  %v2321_v47 = vunpack.i.l.bf16 %v2320_v27  ;;  %2614 = vrot.lane.b32.xlu1 %v2914_v29, %s2764_s11 }
  0xd2   :  { %2609 = vrot.lane.b32.xlu0 %v2829_v9, %s2764_s11  ;;  %v977_v48 = vsel %vm327_vm6, %v2326_v43, %v2327_v42  ;;  %2001 = vmatprep.subr.msk.bf16.mxu0 %vm3097_vm8, %v1999_v39 }
  0xd3   :  { %v975_v49 = vsel %vm327_vm6, %v2321_v47, %v2322_v46  ;;  %v2335_v51 = vpop.permute.xlu1 %2334 }
  0xd4   :  { %v2095_v50 = vpack.c.bf16 %v977_v48, %v975_v49  ;;  %v2330_v52 = vpop.permute.xlu0 %2329  ;;  %v2337_v29 = vunpack.i.h.bf16 %v2335_v51  ;;  %v2336_v9 = vunpack.i.l.bf16 %v2335_v51 }
  0xd5   :  { %v2332_v54 = vunpack.i.h.bf16 %v2330_v52  ;;  %v2331_v55 = vunpack.i.l.bf16 %v2330_v52  ;;  %2624 = vrot.lane.b32.xlu1 %v2922_v30, %s2764_s11 }
  0xd6   :  { %2619 = vrot.lane.b32.xlu0 %v2926_v31, %s2764_s11  ;;  %v974_v56 = vsel %vm327_vm6, %v2336_v9, %v2321_v47  ;;  %v976_v57 = vsel %vm327_vm6, %v2337_v29, %v2326_v43  ;;  %2097 = vmatprep.subr.msk.bf16.mxu1 %vm3097_vm8, %v2095_v50 }
  0xd7   :  { %v330_v36 = vsel %vm327_vm6, %v2332_v54, %v2316_v10  ;;  %v328_v45 = vsel %vm327_vm6, %v2331_v55, %v2311_v19  ;;  %v2098_v58 = vpack.c.bf16 %v976_v57, %v974_v56  ;;  %v2345_v60 = vpop.permute.xlu1 %2344 }
  0xd8   :  { %v2002_v59 = vpack.c.bf16 %v330_v36, %v328_v45  ;;  %v2340_v61 = vpop.permute.xlu0 %2339  ;;  %v2347_v31 = vunpack.i.h.bf16 %v2345_v60  ;;  %v2346_v62 = vunpack.i.l.bf16 %v2345_v60 }
  0xd9   :  { %v2342_v0 = vunpack.i.h.bf16 %v2340_v61  ;;  %v2341_v2 = vunpack.i.l.bf16 %v2340_v61  ;;  %2634 = vrot.lane.b32.xlu1 %v2934_v32, %s2764_s11  ;;  %2100 = vmatpush1.bf16.msk.msra.mxu1 %vm3130_vm10, %v2098_v58 }
  0xda   :  { %2629 = vrot.lane.b32.xlu0 %v2938_v33, %s2764_s11  ;;  %v335_v3 = vsel %vm327_vm6, %v2346_v62, %v2347_v31  ;;  %2004 = vmatpush1.bf16.msk.msra.mxu0 %vm3130_vm10, %v2002_v59 }
  0xdb   :  { %v333_v5 = vsel %vm327_vm6, %v2341_v2, %v2342_v0  ;;  %v2355_v10 = vpop.permute.xlu1 %2354 }
  0xdc   :  { %v2005_v6 = vpack.c.bf16 %v335_v3, %v333_v5  ;;  %v2350_v13 = vpop.permute.xlu0 %2349  ;;  %v2357_v19 = vunpack.i.h.bf16 %v2355_v10  ;;  %v2356_v20 = vunpack.i.l.bf16 %v2355_v10 }
  0xdd   :  { %v2352_v23 = vunpack.i.h.bf16 %v2350_v13  ;;  %v2351_v32 = vunpack.i.l.bf16 %v2350_v13  ;;  %2644 = vrot.lane.b32.xlu1 %v2946_v35, %s2764_s11 }
  0xde   :  { %2639 = vrot.lane.b32.xlu0 %v2844_v14, %s2764_s11  ;;  %v981_v33 = vsel %vm327_vm6, %v2356_v20, %v2357_v19  ;;  %2007 = vmatprep.subr.msk.bf16.mxu0 %vm3097_vm8, %v2005_v6 }
  0xdf   :  { %v979_v39 = vsel %vm327_vm6, %v2351_v32, %v2352_v23  ;;  %v2365_v27 = vpop.permute.xlu1 %2364 }
  0xe0   :  { %v2101_v44 = vpack.c.bf16 %v981_v33, %v979_v39  ;;  %v2360_v34 = vpop.permute.xlu0 %2359  ;;  %v2367_v42 = vunpack.i.h.bf16 %v2365_v27  ;;  %v2366_v43 = vunpack.i.l.bf16 %v2365_v27 }
  0xe1   :  { %v2362_v46 = vunpack.i.h.bf16 %v2360_v34  ;;  %v2361_v47 = vunpack.i.l.bf16 %v2360_v34  ;;  %2654 = vrot.lane.b32.xlu1 %v2956_v37, %s2764_s11 }
  0xe2   :  { %2649 = vrot.lane.b32.xlu0 %v2960_v38, %s2764_s11  ;;  %v978_v14 = vsel %vm327_vm6, %v2366_v43, %v2351_v32  ;;  %v980_v35 = vsel %vm327_vm6, %v2367_v42, %v2356_v20  ;;  %2103 = vmatprep.subr.msk.bf16.mxu1 %vm3097_vm8, %v2101_v44 }
  0xe3   :  { %v334_v48 = vsel %vm327_vm6, %v2362_v46, %v2346_v62  ;;  %v332_v49 = vsel %vm327_vm6, %v2361_v47, %v2341_v2  ;;  %v2104_v50 = vpack.c.bf16 %v980_v35, %v978_v14  ;;  %v2375_v52 = vpop.permute.xlu1 %2374 }
  0xe4   :  { %v2008_v51 = vpack.c.bf16 %v334_v48, %v332_v49  ;;  %v2370_v53 = vpop.permute.xlu0 %2369  ;;  %v2377_v37 = vunpack.i.h.bf16 %v2375_v52  ;;  %v2376_v29 = vunpack.i.l.bf16 %v2375_v52 }
  0xe5   :  { %v2372_v9 = vunpack.i.h.bf16 %v2370_v53  ;;  %v2371_v38 = vunpack.i.l.bf16 %v2370_v53  ;;  %2664 = vrot.lane.b32.xlu1 %v2971_v40, %s2764_s11  ;;  %2106 = vmatpush1.bf16.msk.msra.mxu1 %vm3130_vm10, %v2104_v50 }
  0xe6   :  { %2659 = vrot.lane.b32.xlu0 %v2975_v41, %s2764_s11  ;;  %v412_v54 = vsel %vm408_vm11, %v2376_v29, %v2377_v37  ;;  %2010 = vmatpush1.bf16.msk.msra.mxu0 %vm3130_vm10, %v2008_v51 }
  0xe7   :  { %v410_v55 = vsel %vm408_vm11, %v2371_v38, %v2372_v9  ;;  %v2385_v57 = vpop.permute.xlu1 %2384 }
  0xe8   :  { %v2011_v56 = vpack.c.bf16 %v412_v54, %v410_v55  ;;  %v2380_v36 = vpop.permute.xlu0 %2379  ;;  %v2387_v45 = vunpack.i.h.bf16 %v2385_v57  ;;  %v2386_v58 = vunpack.i.l.bf16 %v2385_v57  ;;  %v2119_v57 = vpack.c.bf16 %v2848_v16, %v2852_v18  ;;  %v2678_v16 = vld [vmem:[#allocation4] sm:$0xff] }
  0xe9   :  { %v2382_v59 = vunpack.i.h.bf16 %v2380_v36  ;;  %v2381_v40 = vunpack.i.l.bf16 %v2380_v36 }
  0xea   :  { %2013 = vmatprep.subr.msk.bf16.mxu0 %vm2995_vm3, %v2011_v56  ;;  %v1057_v41 = vsel %vm408_vm11, %v2386_v58, %v2387_v45  ;;  %v2023_v56 = vpack.c.bf16 %v2808_v1, %v2820_v7  ;;  %v2677_v7 = vld [vmem:[#allocation4 + $0x10] sm:$0xff] }
  0xeb   :  { %v1055_v60 = vsel %vm408_vm11, %v2381_v40, %v2382_v59  ;;  %v2395_v31 = vpop.permute.xlu1 %2394  ;;  %v2025_v18 = vpack.c.bf16 %v2677_v7, %v2678_v16 }
  0xec   :  { %v2107_v61 = vpack.c.bf16 %v1057_v41, %v1055_v60  ;;  %v2390_v62 = vpop.permute.xlu0 %2389  ;;  %v2397_v0 = vunpack.i.h.bf16 %v2395_v31  ;;  %v2396_v2 = vunpack.i.l.bf16 %v2395_v31 }
  0xed   :  { %v2392_v3 = vunpack.i.h.bf16 %v2390_v62  ;;  %v2391_v5 = vunpack.i.l.bf16 %v2390_v62 }
  0xee   :  { %2109 = vmatprep.subr.msk.bf16.mxu1 %vm2995_vm3, %v2107_v61  ;;  %v1054_v6 = vsel %vm408_vm11, %v2396_v2, %v2381_v40  ;;  %v1056_v10 = vsel %vm408_vm11, %v2397_v0, %v2386_v58  ;;  %v2121_v2 = vpack.c.bf16 %v2846_v15, %v2850_v17  ;;  %v2679_v15 = vld [vmem:[#allocation4 + $0x20] sm:$0xff]  ;;  %v2680_v17 = vld [vmem:[#allocation4 + $0x30] sm:$0xff] }
  0xef   :  { %v411_v13 = vsel %vm408_vm11, %v2392_v3, %v2376_v29  ;;  %v409_v19 = vsel %vm408_vm11, %v2391_v5, %v2371_v38  ;;  %v2110_v20 = vpack.c.bf16 %v1056_v10, %v1054_v6  ;;  %v2405_v32 = vpop.permute.xlu1 %2404  ;;  %v2027_v3 = vpack.c.bf16 %v2833_v11, %v2835_v12 }
  0xf0   :  { %v2014_v23 = vpack.c.bf16 %v411_v13, %v409_v19  ;;  %v2400_v33 = vpop.permute.xlu0 %2399  ;;  %v2407_v39 = vunpack.i.h.bf16 %v2405_v32  ;;  %v2406_v44 = vunpack.i.l.bf16 %v2405_v32  ;;  %v2123_v5 = vpack.c.bf16 %v2871_v25, %v2863_v22 }
  0xf1   :  { %v2402_v27 = vunpack.i.h.bf16 %v2400_v33  ;;  %v2401_v34 = vunpack.i.l.bf16 %v2400_v33  ;;  %2112 = vmatpush1.bf16.msk.msra.mxu1 %vm2999_vm4, %v2110_v20  ;;  %v2125_v11 = vpack.c.bf16 %v2869_v24, %v2861_v21 }
  0xf2   :  { %2016 = vmatpush1.bf16.msk.msra.mxu0 %vm2999_vm4, %v2014_v23  ;;  %v416_v42 = vsel %vm408_vm11, %v2406_v44, %v2407_v39  ;;  %v2029_v39 = vpack.c.bf16 %v2680_v17, %v2679_v15 }
  0xf3   :  { %v414_v43 = vsel %vm408_vm11, %v2401_v34, %v2402_v27  ;;  %v2415_v47 = vpop.permute.xlu1 %2414 }
  0xf4   :  { %v2017_v46 = vpack.c.bf16 %v416_v42, %v414_v43  ;;  %v2410_v14 = vpop.permute.xlu0 %2409  ;;  %v2417_v35 = vunpack.i.h.bf16 %v2415_v47  ;;  %v2416_v48 = vunpack.i.l.bf16 %v2415_v47 }
  0xf5   :  { %v2412_v49 = vunpack.i.h.bf16 %v2410_v14  ;;  %v2411_v50 = vunpack.i.l.bf16 %v2410_v14 }
  0xf6   :  { %2019 = vmatprep.subr.msk.bf16.mxu0 %vm2995_vm3, %v2017_v46  ;;  %v1061_v51 = vsel %vm408_vm11, %v2416_v48, %v2417_v35 }
  0xf7   :  { %v1059_v52 = vsel %vm408_vm11, %v2411_v50, %v2412_v49  ;;  %v2425_v37 = vpop.permute.xlu1 %2424 }
  0xf8   :  { %v2113_v53 = vpack.c.bf16 %v1061_v51, %v1059_v52  ;;  %v2420_v29 = vpop.permute.xlu0 %2419  ;;  %v2427_v9 = vunpack.i.h.bf16 %v2425_v37  ;;  %v2426_v38 = vunpack.i.l.bf16 %v2425_v37 }
  0xf9   :  { %v2422_v54 = vunpack.i.h.bf16 %v2420_v29  ;;  %v2421_v55 = vunpack.i.l.bf16 %v2420_v29 }
  0xfa   :  { %2115 = vmatprep.subr.msk.bf16.mxu1 %vm2995_vm3, %v2113_v53  ;;  %v1058_v36 = vsel %vm408_vm11, %v2426_v38, %v2411_v50  ;;  %v1060_v45 = vsel %vm408_vm11, %v2427_v9, %v2416_v48 }
  0xfb   :  { %v415_v58 = vsel %vm408_vm11, %v2422_v54, %v2406_v44  ;;  %v413_v59 = vsel %vm408_vm11, %v2421_v55, %v2401_v34  ;;  %v2116_v40 = vpack.c.bf16 %v1060_v45, %v1058_v36  ;;  %v2435_v60 = vpop.permute.xlu1 %2434 }
  0xfc   :  { %v2020_v41 = vpack.c.bf16 %v415_v58, %v413_v59  ;;  %v2430_v61 = vpop.permute.xlu0 %2429  ;;  %v2437_v31 = vunpack.i.h.bf16 %v2435_v60  ;;  %v2436_v62 = vunpack.i.l.bf16 %v2435_v60 }
  0xfd   :  { %v2432_v0 = vunpack.i.h.bf16 %v2430_v61  ;;  %v2431_v1 = vunpack.i.l.bf16 %v2430_v61  ;;  %2118 = vmatpush1.bf16.msk.msra.mxu1 %vm2999_vm4, %v2116_v40 }
  0xfe   :  { %2022 = vmatpush1.bf16.msk.msra.mxu0 %vm2999_vm4, %v2020_v41  ;;  %2120 = vmatprep.subr.bf16.mxu1 %v2119_v57  ;;  %v509_v6 = vsel %vm505_vm12, %v2436_v62, %v2437_v31 }
  0xff   :  { %2024 = vmatprep.subr.bf16.mxu0 %v2023_v56  ;;  %v507_v10 = vsel %vm505_vm12, %v2431_v1, %v2432_v0  ;;  %v2445_v13 = vpop.permute.xlu1 %2444 }
 0x100   :  { %v2440_v19 = vpop.permute.xlu0 %2439  ;;  %v2447_v20 = vunpack.i.h.bf16 %v2445_v13  ;;  %v2446_v23 = vunpack.i.l.bf16 %v2445_v13  ;;  %v2031_v25 = vpack.c.bf16 %v509_v6, %v507_v10 }
 0x101   :  { %v2442_v32 = vunpack.i.h.bf16 %v2440_v19  ;;  %v2441_v33 = vunpack.i.l.bf16 %v2440_v19  ;;  %2122 = vmatpush1.bf16.msra.mxu1 %v2121_v2 }
 0x102   :  { %2026 = vmatpush1.bf16.msra.mxu0 %v2025_v18  ;;  %v1153_v12 = vsel %vm505_vm12, %v2446_v23, %v2447_v20  ;;  %2124 = vmatprep.subr.bf16.mxu1 %v2123_v5 }
 0x103   :  { %v1151_v22 = vsel %vm505_vm12, %v2441_v33, %v2442_v32  ;;  %2028 = vmatprep.subr.bf16.mxu0 %v2027_v3  ;;  %v2455_v27 = vpop.permute.xlu1 %2454 }
 0x104   :  { %v2127_v44 = vpack.c.bf16 %v1153_v12, %v1151_v22  ;;  %v2450_v34 = vpop.permute.xlu0 %2449  ;;  %v2457_v42 = vunpack.i.h.bf16 %v2455_v27  ;;  %v2456_v43 = vunpack.i.l.bf16 %v2455_v27 }
 0x105   :  { %v2452_v46 = vunpack.i.h.bf16 %v2450_v34  ;;  %v2451_v47 = vunpack.i.l.bf16 %v2450_v34  ;;  %2126 = vmatpush1.bf16.msra.mxu1 %v2125_v11 }
 0x106   :  { %2030 = vmatpush1.bf16.msra.mxu0 %v2029_v39  ;;  %v1150_v14 = vsel %vm505_vm12, %v2456_v43, %v2441_v33  ;;  %v1152_v21 = vsel %vm505_vm12, %v2457_v42, %v2446_v23  ;;  %2129 = vmatprep.subr.msk.bf16.mxu1 %vm3097_vm8, %v2127_v44 }
 0x107   :  { %v508_v24 = vsel %vm505_vm12, %v2452_v46, %v2436_v62  ;;  %v506_v35 = vsel %vm505_vm12, %v2451_v47, %v2431_v1  ;;  %2033 = vmatprep.subr.msk.bf16.mxu0 %vm3097_vm8, %v2031_v25  ;;  %v2130_v48 = vpack.c.bf16 %v1152_v21, %v1150_v14  ;;  %v2465_v50 = vpop.permute.xlu1 %2464 }
 0x108   :  { %v2034_v49 = vpack.c.bf16 %v508_v24, %v506_v35  ;;  %v2460_v51 = vpop.permute.xlu0 %2459  ;;  %v2467_v52 = vunpack.i.h.bf16 %v2465_v50  ;;  %v2466_v53 = vunpack.i.l.bf16 %v2465_v50 }
 0x109   :  { %v2462_v37 = vunpack.i.h.bf16 %v2460_v51  ;;  %v2461_v29 = vunpack.i.l.bf16 %v2460_v51  ;;  %2132 = vmatpush1.bf16.msk.msra.mxu1 %vm3130_vm10, %v2130_v48 }
 0x10a   :  { %2036 = vmatpush1.bf16.msk.msra.mxu0 %vm3130_vm10, %v2034_v49  ;;  %v513_v9 = vsel %vm505_vm12, %v2466_v53, %v2467_v52 }
 0x10b   :  { %v511_v38 = vsel %vm505_vm12, %v2461_v29, %v2462_v37  ;;  %v2475_v55 = vpop.permute.xlu1 %2474 }
 0x10c   :  { %v2037_v54 = vpack.c.bf16 %v513_v9, %v511_v38  ;;  %v2470_v56 = vpop.permute.xlu0 %2469  ;;  %v2477_v57 = vunpack.i.h.bf16 %v2475_v55  ;;  %v2476_v36 = vunpack.i.l.bf16 %v2475_v55 }
 0x10d   :  { %v2472_v45 = vunpack.i.h.bf16 %v2470_v56  ;;  %v2471_v58 = vunpack.i.l.bf16 %v2470_v56 }
 0x10e   :  { %2039 = vmatprep.subr.msk.bf16.mxu0 %vm3097_vm8, %v2037_v54  ;;  %v1157_v59 = vsel %vm505_vm12, %v2476_v36, %v2477_v57 }
 0x10f   :  { %v1155_v40 = vsel %vm505_vm12, %v2471_v58, %v2472_v45  ;;  %v2485_v60 = vpop.permute.xlu1 %2484 }
 0x110   :  { %v2133_v41 = vpack.c.bf16 %v1157_v59, %v1155_v40  ;;  %v2480_v61 = vpop.permute.xlu0 %2479  ;;  %v2487_v31 = vunpack.i.h.bf16 %v2485_v60  ;;  %v2486_v62 = vunpack.i.l.bf16 %v2485_v60 }
 0x111   :  { %v2482_v0 = vunpack.i.h.bf16 %v2480_v61  ;;  %v2481_v1 = vunpack.i.l.bf16 %v2480_v61 }
 0x112   :  { %2135 = vmatprep.subr.msk.bf16.mxu1 %vm3097_vm8, %v2133_v41  ;;  %v1154_v7 = vsel %vm505_vm12, %v2486_v62, %v2471_v58  ;;  %v1156_v16 = vsel %vm505_vm12, %v2487_v31, %v2476_v36 }
 0x113   :  { %v512_v18 = vsel %vm505_vm12, %v2482_v0, %v2466_v53  ;;  %v510_v2 = vsel %vm505_vm12, %v2481_v1, %v2461_v29  ;;  %v2136_v3 = vpack.c.bf16 %v1156_v16, %v1154_v7  ;;  %v2495_v6 = vpop.permute.xlu1 %2494 }
 0x114   :  { %v2040_v5 = vpack.c.bf16 %v512_v18, %v510_v2  ;;  %v2490_v10 = vpop.permute.xlu0 %2489  ;;  %v2497_v13 = vunpack.i.h.bf16 %v2495_v6  ;;  %v2496_v19 = vunpack.i.l.bf16 %v2495_v6 }
 0x115   :  { %v2492_v20 = vunpack.i.h.bf16 %v2490_v10  ;;  %v2491_v23 = vunpack.i.l.bf16 %v2490_v10  ;;  %2138 = vmatpush1.bf16.msk.msra.mxu1 %vm3130_vm10, %v2136_v3 }
 0x116   :  { %2042 = vmatpush1.bf16.msk.msra.mxu0 %vm3130_vm10, %v2040_v5  ;;  %v590_v32 = vsel %vm586_vm13, %v2496_v19, %v2497_v13 }
 0x117   :  { %v588_v33 = vsel %vm586_vm13, %v2491_v23, %v2492_v20  ;;  %v2505_v17 = vpop.permute.xlu1 %2504 }
 0x118   :  { %v2043_v15 = vpack.c.bf16 %v590_v32, %v588_v33  ;;  %v2500_v39 = vpop.permute.xlu0 %2499  ;;  %v2507_v11 = vunpack.i.h.bf16 %v2505_v17  ;;  %v2506_v12 = vunpack.i.l.bf16 %v2505_v17 }
 0x119   :  { %v2502_v22 = vunpack.i.h.bf16 %v2500_v39  ;;  %v2501_v25 = vunpack.i.l.bf16 %v2500_v39 }
 0x11a   :  { %2045 = vmatprep.subr.msk.bf16.mxu0 %vm2995_vm3, %v2043_v15  ;;  %v1233_v44 = vsel %vm586_vm13, %v2506_v12, %v2507_v11 }
 0x11b   :  { %v1231_v27 = vsel %vm586_vm13, %v2501_v25, %v2502_v22  ;;  %v2515_v42 = vpop.permute.xlu1 %2514 }
 0x11c   :  { %v2139_v34 = vpack.c.bf16 %v1233_v44, %v1231_v27  ;;  %v2510_v43 = vpop.permute.xlu0 %2509  ;;  %v2517_v46 = vunpack.i.h.bf16 %v2515_v42  ;;  %v2516_v47 = vunpack.i.l.bf16 %v2515_v42 }
 0x11d   :  { %v2512_v14 = vunpack.i.h.bf16 %v2510_v43  ;;  %v2511_v21 = vunpack.i.l.bf16 %v2510_v43 }
 0x11e   :  { %2141 = vmatprep.subr.msk.bf16.mxu1 %vm2995_vm3, %v2139_v34  ;;  %v1230_v24 = vsel %vm586_vm13, %v2516_v47, %v2501_v25  ;;  %v1232_v35 = vsel %vm586_vm13, %v2517_v46, %v2506_v12 }
 0x11f   :  { %v589_v48 = vsel %vm586_vm13, %v2512_v14, %v2496_v19  ;;  %v587_v49 = vsel %vm586_vm13, %v2511_v21, %v2491_v23  ;;  %v2142_v50 = vpack.c.bf16 %v1232_v35, %v1230_v24  ;;  %v2525_v52 = vpop.permute.xlu1 %2524 }
 0x120   :  { %v2046_v51 = vpack.c.bf16 %v589_v48, %v587_v49  ;;  %v2520_v53 = vpop.permute.xlu0 %2519  ;;  %v2527_v37 = vunpack.i.h.bf16 %v2525_v52  ;;  %v2526_v29 = vunpack.i.l.bf16 %v2525_v52 }
 0x121   :  { %v2522_v9 = vunpack.i.h.bf16 %v2520_v53  ;;  %v2521_v38 = vunpack.i.l.bf16 %v2520_v53  ;;  %2144 = vmatpush1.bf16.msk.msra.mxu1 %vm2999_vm4, %v2142_v50 }
 0x122   :  { %2048 = vmatpush1.bf16.msk.msra.mxu0 %vm2999_vm4, %v2046_v51  ;;  %v594_v54 = vsel %vm586_vm13, %v2526_v29, %v2527_v37 }
 0x123   :  { %v592_v55 = vsel %vm586_vm13, %v2521_v38, %v2522_v9  ;;  %v2535_v57 = vpop.permute.xlu1 %2534 }
 0x124   :  { %v2049_v56 = vpack.c.bf16 %v594_v54, %v592_v55  ;;  %v2530_v36 = vpop.permute.xlu0 %2529  ;;  %v2537_v45 = vunpack.i.h.bf16 %v2535_v57  ;;  %v2536_v58 = vunpack.i.l.bf16 %v2535_v57 }
 0x125   :  { %v2532_v59 = vunpack.i.h.bf16 %v2530_v36  ;;  %v2531_v40 = vunpack.i.l.bf16 %v2530_v36 }
 0x126   :  { %2051 = vmatprep.subr.msk.bf16.mxu0 %vm2995_vm3, %v2049_v56  ;;  %v1237_v41 = vsel %vm586_vm13, %v2536_v58, %v2537_v45 }
 0x127   :  { %v1235_v60 = vsel %vm586_vm13, %v2531_v40, %v2532_v59  ;;  %v2545_v31 = vpop.permute.xlu1 %2544 }
 0x128   :  { %v2145_v61 = vpack.c.bf16 %v1237_v41, %v1235_v60  ;;  %v2540_v62 = vpop.permute.xlu0 %2539  ;;  %v2547_v0 = vunpack.i.h.bf16 %v2545_v31  ;;  %v2546_v1 = vunpack.i.l.bf16 %v2545_v31 }
 0x129   :  { %v2542_v7 = vunpack.i.h.bf16 %v2540_v62  ;;  %v2541_v16 = vunpack.i.l.bf16 %v2540_v62 }
 0x12a   :  { %2147 = vmatprep.subr.msk.bf16.mxu1 %vm2995_vm3, %v2145_v61  ;;  %v1234_v18 = vsel %vm586_vm13, %v2546_v1, %v2531_v40  ;;  %v1236_v2 = vsel %vm586_vm13, %v2547_v0, %v2536_v58 }
 0x12b   :  { %v593_v3 = vsel %vm586_vm13, %v2542_v7, %v2526_v29  ;;  %v591_v5 = vsel %vm586_vm13, %v2541_v16, %v2521_v38  ;;  %v2148_v6 = vpack.c.bf16 %v1236_v2, %v1234_v18  ;;  %v2555_v13 = vpop.permute.xlu1 %2554 }
 0x12c   :  { %v2052_v10 = vpack.c.bf16 %v593_v3, %v591_v5  ;;  %v2550_v19 = vpop.permute.xlu0 %2549  ;;  %v2557_v20 = vunpack.i.h.bf16 %v2555_v13  ;;  %v2556_v23 = vunpack.i.l.bf16 %v2555_v13 }
 0x12d   :  { %v2552_v32 = vunpack.i.h.bf16 %v2550_v19  ;;  %v2551_v33 = vunpack.i.l.bf16 %v2550_v19  ;;  %2150 = vmatpush1.bf16.msk.msra.mxu1 %vm2999_vm4, %v2148_v6 }
 0x12e   :  { %2054 = vmatpush1.bf16.msk.msra.mxu0 %vm2999_vm4, %v2052_v10  ;;  %v671_v15 = vsel %vm667_vm14, %v2556_v23, %v2557_v20 }
 0x12f   :  { %v669_v63 = vsel %vm667_vm14, %v2551_v33, %v2552_v32  ;;  %v2565_v17 = vpop.permute.xlu1 %2564 }
 0x130   :  { %v2560_v39 = vpop.permute.xlu0 %2559  ;;  %v2055_v11 = vpack.c.bf16 %v671_v15, %v669_v63  ;;  %v2567_v12 = vunpack.i.h.bf16 %v2565_v17  ;;  %v2566_v22 = vunpack.i.l.bf16 %v2565_v17 }
 0x131   :  { %v2562_v25 = vunpack.i.h.bf16 %v2560_v39  ;;  %v2561_v44 = vunpack.i.l.bf16 %v2560_v39 }
 0x132   :  { %2056 = vmatprep.subr.bf16.mxu0 %v2055_v11  ;;  %v1313_v34 = vsel %vm667_vm14, %v2566_v22, %v2567_v12 }
 0x133   :  { %v1311_v27 = vsel %vm667_vm14, %v2561_v44, %v2562_v25  ;;  %v2575_v42 = vpop.permute.xlu1 %2574 }
 0x134   :  { %v2570_v43 = vpop.permute.xlu0 %2569  ;;  %v2151_v8 = vpack.c.bf16 %v1313_v34, %v1311_v27  ;;  %v2577_v46 = vunpack.i.h.bf16 %v2575_v42  ;;  %v2576_v47 = vunpack.i.l.bf16 %v2575_v42 }
 0x135   :  { %v2572_v14 = vunpack.i.h.bf16 %v2570_v43  ;;  %v2571_v21 = vunpack.i.l.bf16 %v2570_v43 }
 0x136   :  { %2152 = vmatprep.subr.bf16.mxu1 %v2151_v8  ;;  %v1310_v48 = vsel %vm667_vm14, %v2576_v47, %v2561_v44  ;;  %v1312_v49 = vsel %vm667_vm14, %v2577_v46, %v2566_v22 }
 0x137   :  { %v668_v24 = vsel %vm667_vm14, %v2571_v21, %v2551_v33  ;;  %v670_v35 = vsel %vm667_vm14, %v2572_v14, %v2556_v23  ;;  %v2585_v50 = vpop.permute.xlu1 %2584  ;;  %v2153_v53 = vpack.c.bf16 %v1312_v49, %v1310_v48 }
 0x138   :  { %v2580_v51 = vpop.permute.xlu0 %2579  ;;  %v2057_v52 = vpack.c.bf16 %v670_v35, %v668_v24  ;;  %v2587_v37 = vunpack.i.h.bf16 %v2585_v50  ;;  %v2586_v29 = vunpack.i.l.bf16 %v2585_v50 }
 0x139   :  { %v2582_v9 = vunpack.i.h.bf16 %v2580_v51  ;;  %v2581_v38 = vunpack.i.l.bf16 %v2580_v51  ;;  %2154 = vmatpush1.bf16.msra.mxu1 %v2153_v53 }
 0x13a   :  { %2058 = vmatpush1.bf16.msra.mxu0 %v2057_v52  ;;  %v675_v55 = vsel %vm667_vm14, %v2586_v29, %v2587_v37 }
 0x13b   :  { %v673_v54 = vsel %vm667_vm14, %v2581_v38, %v2582_v9  ;;  %v2595_v56 = vpop.permute.xlu1 %2594 }
 0x13c   :  { %v2590_v57 = vpop.permute.xlu0 %2589  ;;  %v2059_v36 = vpack.c.bf16 %v675_v55, %v673_v54  ;;  %v2597_v45 = vunpack.i.h.bf16 %v2595_v56  ;;  %v2596_v58 = vunpack.i.l.bf16 %v2595_v56 }
 0x13d   :  { %v2592_v59 = vunpack.i.h.bf16 %v2590_v57  ;;  %v2591_v40 = vunpack.i.l.bf16 %v2590_v57 }
 0x13e   :  { %2060 = vmatprep.subr.bf16.mxu0 %v2059_v36  ;;  %v1317_v60 = vsel %vm667_vm14, %v2596_v58, %v2597_v45 }
 0x13f   :  { %v1315_v41 = vsel %vm667_vm14, %v2591_v40, %v2592_v59  ;;  %v2605_v61 = vpop.permute.xlu1 %2604 }
 0x140   :  { %v2600_v31 = vpop.permute.xlu0 %2599  ;;  %v2155_v62 = vpack.c.bf16 %v1317_v60, %v1315_v41  ;;  %v2607_v0 = vunpack.i.h.bf16 %v2605_v61  ;;  %v2606_v1 = vunpack.i.l.bf16 %v2605_v61 }
 0x141   :  { %v2602_v7 = vunpack.i.h.bf16 %v2600_v31  ;;  %v2601_v16 = vunpack.i.l.bf16 %v2600_v31 }
 0x142   :  { %2156 = vmatprep.subr.bf16.mxu1 %v2155_v62  ;;  %v1314_v3 = vsel %vm667_vm14, %v2606_v1, %v2591_v40  ;;  %v1316_v5 = vsel %vm667_vm14, %v2607_v0, %v2596_v58 }
 0x143   :  { %v672_v18 = vsel %vm667_vm14, %v2601_v16, %v2581_v38  ;;  %v674_v2 = vsel %vm667_vm14, %v2602_v7, %v2586_v29  ;;  %v2615_v6 = vpop.permute.xlu1 %2614  ;;  %v2157_v19 = vpack.c.bf16 %v1316_v5, %v1314_v3 }
 0x144   :  { %v2610_v10 = vpop.permute.xlu0 %2609  ;;  %v2061_v13 = vpack.c.bf16 %v674_v2, %v672_v18  ;;  %v2617_v20 = vunpack.i.h.bf16 %v2615_v6  ;;  %v2616_v23 = vunpack.i.l.bf16 %v2615_v6  ;;  %v1415_v6 = vld [vmem:[#allocation7 + $0x8] sm:$0x7] }
 0x145   :  { %v2612_v32 = vunpack.i.h.bf16 %v2610_v10  ;;  %v2611_v33 = vunpack.i.l.bf16 %v2610_v10  ;;  %2158 = vmatpush1.bf16.msra.mxu1 %v2157_v19 }
 0x146   :  { %2062 = vmatpush1.bf16.msra.mxu0 %v2061_v13  ;;  %v744_v63 = vsel %vm740_vm15, %v2616_v23, %v2617_v20 }
 0x147   :  { %v742_v15 = vsel %vm740_vm15, %v2611_v33, %v2612_v32  ;;  %v2625_v39 = vpop.permute.xlu1 %2624 }
 0x148   :  { %v2063_v17 = vpack.c.bf16 %v744_v63, %v742_v15  ;;  %v2620_v11 = vpop.permute.xlu0 %2619  ;;  %v2627_v12 = vunpack.i.h.bf16 %v2625_v39  ;;  %v2626_v22 = vunpack.i.l.bf16 %v2625_v39  ;;  %1774 = vmatmul.mubr.f32.vlgmr.msra.gmra.mrb[0].mxu1 %v3095_v26 }
 0x149   :  { %v2622_v25 = vunpack.i.h.bf16 %v2620_v11  ;;  %v2621_v44 = vunpack.i.l.bf16 %v2620_v11  ;;  %1632 = vmatmul.mubr.f32.vlgmr.msra.gmra.mrb[0].mxu0 %v3095_v26  ;;  %1844 = vmatprep.mubr.f32.mxu1 %v2757_v4 }
 0x14a   :  { %2065 = vmatprep.subr.msk.bf16.mxu0 %vm3097_vm8, %v2063_v17  ;;  %1702 = vmatprep.mubr.f32.mxu0 %v2757_v4  ;;  %v1385_v27 = vsel %vm740_vm15, %v2626_v22, %v2627_v12 }
 0x14b   :  { %v1383_v34 = vsel %vm740_vm15, %v2621_v44, %v2622_v25  ;;  %v2635_v43 = vpop.permute.xlu1 %2634 }
 0x14c   :  { %v2159_v42 = vpack.c.bf16 %v1385_v27, %v1383_v34  ;;  %v2630_v8 = vpop.permute.xlu0 %2629  ;;  %v2637_v46 = vunpack.i.h.bf16 %v2635_v43  ;;  %v2636_v47 = vunpack.i.l.bf16 %v2635_v43 }
 0x14d   :  { %v2632_v14 = vunpack.i.h.bf16 %v2630_v8  ;;  %v2631_v21 = vunpack.i.l.bf16 %v2630_v8 }
 0x14e   :  { %2161 = vmatprep.subr.msk.bf16.mxu1 %vm3097_vm8, %v2159_v42  ;;  %v1382_v26 = vsel %vm740_vm15, %v2636_v47, %v2621_v44  ;;  %v1384_v24 = vsel %vm740_vm15, %v2637_v46, %v2626_v22 }
 0x14f   :  { %v743_v35 = vsel %vm740_vm15, %v2632_v14, %v2616_v23  ;;  %v741_v48 = vsel %vm740_vm15, %v2631_v21, %v2611_v33  ;;  %v2162_v49 = vpack.c.bf16 %v1384_v24, %v1382_v26  ;;  %v2645_v50 = vpop.permute.xlu1 %2644 }
 0x150   :  { %v2066_v4 = vpack.c.bf16 %v743_v35, %v741_v48  ;;  %v2640_v51 = vpop.permute.xlu0 %2639  ;;  %v2647_v52 = vunpack.i.h.bf16 %v2645_v50  ;;  %v2646_v53 = vunpack.i.l.bf16 %v2645_v50 }
 0x151   :  { %v2642_v37 = vunpack.i.h.bf16 %v2640_v51  ;;  %v2641_v29 = vunpack.i.l.bf16 %v2640_v51  ;;  %2164 = vmatpush1.bf16.msk.msra.mxu1 %vm3130_vm10, %v2162_v49 }
 0x152   :  { %2068 = vmatpush1.bf16.msk.msra.mxu0 %vm3130_vm10, %v2066_v4  ;;  %v748_v9 = vsel %vm740_vm15, %v2646_v53, %v2647_v52 }
 0x153   :  { %v746_v38 = vsel %vm740_vm15, %v2641_v29, %v2642_v37  ;;  %v2655_v55 = vpop.permute.xlu1 %2654 }
 0x154   :  { %v2069_v54 = vpack.c.bf16 %v748_v9, %v746_v38  ;;  %v2650_v56 = vpop.permute.xlu0 %2649  ;;  %v2657_v57 = vunpack.i.h.bf16 %v2655_v55  ;;  %v2656_v36 = vunpack.i.l.bf16 %v2655_v55 }
 0x155   :  { %v2652_v45 = vunpack.i.h.bf16 %v2650_v56  ;;  %v2651_v58 = vunpack.i.l.bf16 %v2650_v56 }
 0x156   :  { %2071 = vmatprep.subr.msk.bf16.mxu0 %vm3097_vm8, %v2069_v54  ;;  %v1389_v59 = vsel %vm740_vm15, %v2656_v36, %v2657_v57 }
 0x157   :  { %v1387_v40 = vsel %vm740_vm15, %v2651_v58, %v2652_v45  ;;  %v2665_v60 = vpop.permute.xlu1 %2664 }
 0x158   :  { %v2165_v41 = vpack.c.bf16 %v1389_v59, %v1387_v40  ;;  %v2660_v61 = vpop.permute.xlu0 %2659  ;;  %v2667_v31 = vunpack.i.h.bf16 %v2665_v60  ;;  %v2666_v62 = vunpack.i.l.bf16 %v2665_v60 }
 0x159   :  { %v2662_v0 = vunpack.i.h.bf16 %v2660_v61  ;;  %v2661_v1 = vunpack.i.l.bf16 %v2660_v61 }
 0x15a   :  { %2167 = vmatprep.subr.msk.bf16.mxu1 %vm3097_vm8, %v2165_v41  ;;  %v1386_v7 = vsel %vm740_vm15, %v2666_v62, %v2651_v58  ;;  %v1388_v16 = vsel %vm740_vm15, %v2667_v31, %v2656_v36 }
 0x15b   :  { %v747_v18 = vsel %vm740_vm15, %v2662_v0, %v2646_v53  ;;  %v745_v2 = vsel %vm740_vm15, %v2661_v1, %v2641_v29  ;;  %v2168_v3 = vpack.c.bf16 %v1388_v16, %v1386_v7 }
 0x15c   :  { %v2072_v5 = vpack.c.bf16 %v747_v18, %v745_v2 }
 0x15d   :  { %2170 = vmatpush1.bf16.msk.msra.mxu1 %vm3130_vm10, %v2168_v3 }
 0x15e   :  { %2074 = vmatpush1.bf16.msk.msra.mxu0 %vm3130_vm10, %v2072_v5 }
 0x160   :  { %1882 = vmatmul.mubr.msk.f32.vlgmr.msra.gmra.mrb[0].mxu1 %vm1564_vm0, %v1415_v6 }
 0x161   :  { %1881 = vmatmul.mubr.msk.f32.vlgmr.msra.gmra.mrb[0].mxu0 %vm1564_vm0, %v1415_v6 }
 0x233   :  { %v1846_v10 = vpop.f32.mrb[0].mxu1 }
 0x234   :  { %v1704_v28 = vpop.f32.mrb[0].mxu0  ;;  %v1848_v19 = vpop.f32.mrb[1].mxu1 }
 0x235   :  { %2669 = vtanh.f32 %v1704_v28  ;;  %v1706_v13 = vpop.f32.mrb[1].mxu0 }
 0x236   :  { %2671 = vtanh.f32 %v1846_v10 }
 0x237   :  { %2673 = vtanh.f32 %v1706_v13 }
 0x238   :  { %2675 = vtanh.f32 %v1848_v19 }
 0x23f   :  { %v2670_v20 = vpop.eup %2669 }
 0x240   :  { %v2672_v23 = vpop.eup %2671 }
 0x241   :  { %v2674_v32 = vpop.eup %2673 }
 0x242   :  { %v2676_v33 = vpop.eup %2675  ;;  %v1859_v30 = vcombine.low %v2670_v20, %v2674_v32 }
 0x243   :  { %v1860_v63 = vcombine.low %v2672_v23, %v2676_v33 }
 0x244   :  { %1863 = vst [vmem:[#allocation9] sm:$0x77] %v1859_v30 }
 0x245   :  { %1864 = vst [vmem:[#allocation9 + $0x8] sm:$0x77] %v1860_v63 }
 0x246   :  { %2736 = shalt.err (!%p2733_p6)
}
 0x247   :  { %s2737_s17 = scalar_lea.hbm %s3344_s2, 256 }
 0x248   :  { %p2738_p7 = scmp.ne.s32.totalorder %s3344_s2, %s2737_s17  ;;  %p2741_p8 = scmp.lt.u32.totalorder %s2737_s17, %s3344_s2 }
 0x24a   :  { %p2743_p9 = pnand %p2741_p8, %p2738_p7 }
 0x24c   :  { %2746 = shalt.err (!%p2743_p9)
}
 0x24d   :  { %1874 = dma.vmem_to_hbm [thread:$0]  %s1872_s13, 256, %s3344_s2, [#allocation6]  }
 0x24e   :  { %2751 = dma.done.wait [#allocation6], 256  }
 0x24f   :  { %2752 = vsyncadd [#allocation6], 4294967040 }
 0x250   :  { %1878 = vsyncpa [#allocation5], 1 }
 0x251   :  { %1879 = vsyncpa [#allocation8], 1 }
 0x252   :  { %1880 = vsyncpa [#allocation6], 1 }

</bundles_post_ra>
